<compile_context>
chip_gen: v5e
topology: v5e:2x2
jax: 0.10.0
libtpu: 0.0.40
codegen_flags: <defaults>
</compile_context>

<pallas_src>
import functools
import math

import jax
import jax.numpy as jnp
from jax.experimental import pallas as pl
from jax.experimental.pallas import tpu as pltpu


# --------------------------------------------------------------------------
# In-kernel helpers (traced inline)
# --------------------------------------------------------------------------
def _layernorm(x, gamma, beta, eps):
    mean = jnp.mean(x, axis=-1, keepdims=True)
    var = jnp.mean((x - mean) ** 2, axis=-1, keepdims=True)
    return (x - mean) * jax.lax.rsqrt(var + eps) * gamma + beta


def _rosc(x, angle):
    # Rotational skip connection (see TODO above).
    return x * jnp.cos(angle) + jnp.sin(angle)


# --------------------------------------------------------------------------
# Kernel 1: pre-LN -> fused-QKV MHA -> output proj -> RoSC   (grid over batch)
# --------------------------------------------------------------------------
def attn_block_kernel(src_ref, g_ref, b_ref, wqkv_ref, bqkv_ref,
                      wo_ref, bo_ref, o_ref, *, num_heads, scale, eps):
    x = src_ref[0]                                   # (S, E)
    S, E = x.shape
    dh = E // num_heads

    # pre-LayerNorm (fused)
    xn = _layernorm(x, g_ref[...], b_ref[...], eps)

    # fused Q/K/V projection: one (S,E) x (E,3E) matmul
    qkv = jnp.dot(xn, wqkv_ref[...],
                  preferred_element_type=jnp.float32) + bqkv_ref[...]

    # per-head attention without transposes / concatenates:
    #   scores via dot_general contracting last dims, output projection
    #   accumulated head-by-head against row slices of Wo.
    angle = jnp.zeros((S, E), dtype=jnp.float32)
    for h in range(num_heads):                       # static unroll (small H)
        lo = h * dh
        qh = qkv[:, lo:lo + dh]                      # (S, dh)
        kh = qkv[:, E + lo:E + lo + dh]              # (S, dh)
        vh = qkv[:, 2 * E + lo:2 * E + lo + dh]      # (S, dh)

        s = jax.lax.dot_general(
            qh, kh, (((1,), (1,)), ((), ())),
            preferred_element_type=jnp.float32) * scale      # (S, S)
        m = jnp.max(s, axis=-1, keepdims=True)
        p = jnp.exp(s - m)
        denom = jnp.sum(p, axis=-1, keepdims=True)
        p = p * pl.reciprocal(denom, approx=True)            # EUP, ~free

        ctx_h = jnp.dot(p, vh, preferred_element_type=jnp.float32)   # (S, dh)
        angle = angle + jnp.dot(ctx_h, wo_ref[lo:lo + dh, :],
                                preferred_element_type=jnp.float32)
    angle = angle + bo_ref[...]

    # fused RoSC residual
    o_ref[0] = _rosc(x, angle).astype(o_ref.dtype)


# --------------------------------------------------------------------------
# Kernel 2: pre-LN -> FFN -> RoSC   (grid over row tiles of N = B*S)
# --------------------------------------------------------------------------
def ffn_block_kernel(src_ref, g_ref, b_ref, w1_ref, c1_ref, w2_ref, c2_ref,
                     o_ref, *, eps):
    x = src_ref[...]                                 # (tile_N, E)
    xn = _layernorm(x, g_ref[...], b_ref[...], eps)
    h = jnp.dot(xn, w1_ref[...], preferred_element_type=jnp.float32) + c1_ref[...]
    h = jnp.maximum(h, 0.0)
    angle = jnp.dot(h, w2_ref[...], preferred_element_type=jnp.float32) + c2_ref[...]
    o_ref[...] = _rosc(x, angle).astype(o_ref.dtype)


# --------------------------------------------------------------------------
# Wrappers (pallas_call setup)
# --------------------------------------------------------------------------
def attention_block(src, p, num_heads, eps=1e-5):
    """src: (B, S, E) -> (B, S, E).  norm1 -> MHA -> RoSC, fused."""
    B, S, E = src.shape
    dh = E // num_heads
    scale = 1.0 / math.sqrt(dh)
    kern = functools.partial(attn_block_kernel,
                             num_heads=num_heads, scale=scale, eps=eps)
    res = lambda shape: pl.BlockSpec(shape, lambda b: (0, 0))  # resident weights

    return pl.pallas_call(
        kern,
        out_shape=jax.ShapeDtypeStruct((B, S, E), src.dtype),
        grid=(B,),
        in_specs=[
            pl.BlockSpec((1, S, E), lambda b: (b, 0, 0)),
            res((1, E)), res((1, E)),          # LN1 gamma/beta
            res((E, 3 * E)), res((1, 3 * E)),  # fused QKV
            res((E, E)), res((1, E)),          # output projection
        ],
        out_specs=pl.BlockSpec((1, S, E), lambda b: (b, 0, 0)),
        compiler_params=pltpu.CompilerParams(
            dimension_semantics=("parallel",)),
    )(src, p["ln_g"], p["ln_b"], p["wqkv"], p["bqkv"], p["wo"], p["bo"])


def _row_tile(n, candidates=(256, 128, 64, 32, 16, 8)):
    for t in candidates:
        if t <= n and n % t == 0:
            return t
    return n


def ffn_block(src, p, eps=1e-5):
    """src: (B, S, E) -> (B, S, E).  norm2 -> FFN -> RoSC, fused, row-tiled."""
    B, S, E = src.shape
    H = p["w1"].shape[1]
    N = B * S
    tn = _row_tile(N)
    xf = src.reshape(N, E)
    kern = functools.partial(ffn_block_kernel, eps=eps)
    res = lambda shape: pl.BlockSpec(shape, lambda i: (0, 0))  # resident weights

    out = pl.pallas_call(
        kern,
        out_shape=jax.ShapeDtypeStruct((N, E), src.dtype),
        grid=(N // tn,),
        in_specs=[
            pl.BlockSpec((tn, E), lambda i: (i, 0)),
            res((1, E)), res((1, E)),          # LN2 gamma/beta
            res((E, H)), res((1, H)),          # FFN layer 1
            res((H, E)), res((1, E)),          # FFN layer 2
        ],
        out_specs=pl.BlockSpec((tn, E), lambda i: (i, 0)),
        compiler_params=pltpu.CompilerParams(
            dimension_semantics=("parallel",)),
    )(xf, p["ln_g"], p["ln_b"], p["w1"], p["b1"], p["w2"], p["b2"])
    return out.reshape(B, S, E)


def rosc_transformer_encoder_layer(src, params, num_heads):
    src = attention_block(src, params["attn"], num_heads)
    src = ffn_block(src, params["ff"])
    return src


# --------------------------------------------------------------------------
# Pure-JAX reference (same math, exact softmax) for a correctness check
# --------------------------------------------------------------------------
def reference_forward(src, params, num_heads, eps=1e-5):
    pa, pf = params["attn"], params["ff"]

    def ln(x, g, b):
        m = jnp.mean(x, -1, keepdims=True)
        v = jnp.mean((x - m) ** 2, -1, keepdims=True)
        return (x - m) * jax.lax.rsqrt(v + eps) * g + b

    rosc = lambda x, a: x * jnp.cos(a) + jnp.sin(a)

    B, S, E = src.shape
    dh = E // num_heads

    xn = ln(src, pa["ln_g"], pa["ln_b"])
    qkv = xn @ pa["wqkv"] + pa["bqkv"]
    q, k, v = qkv[..., :E], qkv[..., E:2 * E], qkv[..., 2 * E:]
    q = q.reshape(B, S, num_heads, dh).transpose(0, 2, 1, 3)
    k = k.reshape(B, S, num_heads, dh).transpose(0, 2, 1, 3)
    v = v.reshape(B, S, num_heads, dh).transpose(0, 2, 1, 3)
    s = jnp.einsum("bhqd,bhkd->bhqk", q, k) / math.sqrt(dh)
    p = jax.nn.softmax(s, axis=-1)
    ctx = jnp.einsum("bhqk,bhkd->bhqd", p, v).transpose(0, 2, 1, 3).reshape(B, S, E)
    angle = ctx @ pa["wo"] + pa["bo"]
    src = rosc(src, angle)

    xn = ln(src, pf["ln_g"], pf["ln_b"])
    h = jnp.maximum(xn @ pf["w1"] + pf["b1"], 0.0)
    angle = h @ pf["w2"] + pf["b2"]
    return rosc(src, angle)


# --------------------------------------------------------------------------
# Deterministic parameter construction
# --------------------------------------------------------------------------
def init_params(key, E, H):
    ks = jax.random.split(key, 8)

    def xavier(k, shape):
        fan_in, fan_out = shape
        lim = math.sqrt(6.0 / (fan_in + fan_out))
        return jax.random.uniform(k, shape, jnp.float32, -lim, lim)

    attn = dict(
        ln_g=1.0 + 0.02 * jax.random.normal(ks[0], (1, E), jnp.float32),
        ln_b=0.02 * jax.random.normal(ks[1], (1, E), jnp.float32),
        wqkv=xavier(ks[2], (E, 3 * E)),
        bqkv=jnp.zeros((1, 3 * E), jnp.float32),
        wo=xavier(ks[3], (E, E)),
        bo=jnp.zeros((1, E), jnp.float32),
    )
    ff = dict(
        ln_g=1.0 + 0.02 * jax.random.normal(ks[4], (1, E), jnp.float32),
        ln_b=0.02 * jax.random.normal(ks[5], (1, E), jnp.float32),
        w1=xavier(ks[6], (E, H)),
        b1=jnp.zeros((1, H), jnp.float32),
        w2=xavier(ks[7], (H, E)),
        b2=jnp.zeros((1, E), jnp.float32),
    )
    return dict(attn=attn, ff=ff)


# --------------------------------------------------------------------------
if __name__ == "__main__":
    B, S, E, NHEAD, H = 2, 16, 32, 4, 64

    key = jax.random.PRNGKey(0)
    k_src, k_par = jax.random.split(key)
    src = jax.random.normal(k_src, (B, S, E), jnp.float32)
    params = init_params(k_par, E, H)

    out = rosc_transformer_encoder_layer(src, params, NHEAD)
    out = jax.block_until_ready(out)

    ref = reference_forward(src, params, NHEAD)
    assert out.shape == (B, S, E)
    assert bool(jnp.all(jnp.isfinite(out)))
    max_err = float(jnp.max(jnp.abs(out - ref)))
    assert max_err < 5e-2, f"mismatch vs reference: max abs err {max_err}"
    print("KERNEL_OK")
</pallas_src>

<mosaic_0001>
module attributes {stable_mosaic.version = 11 : i64} {
  func.func @attn_block_kernel(%arg0: i32, %arg1: memref<1x16x32xf32, #tpu.memory_space<vmem>>, %arg2: memref<1x32xf32, #tpu.memory_space<vmem>>, %arg3: memref<1x32xf32, #tpu.memory_space<vmem>>, %arg4: memref<32x96xf32, #tpu.memory_space<vmem>>, %arg5: memref<1x96xf32, #tpu.memory_space<vmem>>, %arg6: memref<32x32xf32, #tpu.memory_space<vmem>>, %arg7: memref<1x32xf32, #tpu.memory_space<vmem>>, %arg8: memref<1x16x32xf32, #tpu.memory_space<vmem>>) attributes {dimension_semantics = [#tpu.dimension_semantics<parallel>], iteration_bounds = array<i64: 2>, scalar_prefetch = 0 : i64, scratch_operands = 0 : i64, tpu.core_type = #tpu.core_type<tc>, window_params = [{transform_indices = @transform_0, window_bounds = array<i64: 1, 16, 32>}, {pipeline_mode = #tpu.pipeline_mode<synchronous>, transform_indices = @transform_1, window_bounds = array<i64: 1, 32>}, {pipeline_mode = #tpu.pipeline_mode<synchronous>, transform_indices = @transform_2, window_bounds = array<i64: 1, 32>}, {pipeline_mode = #tpu.pipeline_mode<synchronous>, transform_indices = @transform_3, window_bounds = array<i64: 32, 96>}, {pipeline_mode = #tpu.pipeline_mode<synchronous>, transform_indices = @transform_4, window_bounds = array<i64: 1, 96>}, {pipeline_mode = #tpu.pipeline_mode<synchronous>, transform_indices = @transform_5, window_bounds = array<i64: 32, 32>}, {pipeline_mode = #tpu.pipeline_mode<synchronous>, transform_indices = @transform_6, window_bounds = array<i64: 1, 32>}, {transform_indices = @transform_7, window_bounds = array<i64: 1, 16, 32>}]} {
    %c0 = arith.constant 0 : index
    %c0_0 = arith.constant 0 : index
    %c0_1 = arith.constant 0 : index
    %0 = vector.load %arg1[%c0, %c0_0, %c0_1] : memref<1x16x32xf32, #tpu.memory_space<vmem>>, vector<1x16x32xf32>
    %1 = vector.shape_cast %0 : vector<1x16x32xf32> to vector<16x32xf32>
    %c0_2 = arith.constant 0 : index
    %c0_3 = arith.constant 0 : index
    %2 = vector.load %arg2[%c0_2, %c0_3] : memref<1x32xf32, #tpu.memory_space<vmem>>, vector<1x32xf32>
    %c0_4 = arith.constant 0 : index
    %c0_5 = arith.constant 0 : index
    %3 = vector.load %arg3[%c0_4, %c0_5] : memref<1x32xf32, #tpu.memory_space<vmem>>, vector<1x32xf32>
    %cst = arith.constant dense<0.000000e+00> : vector<16xf32>
    %4 = vector.multi_reduction <add>, %1, %cst [1] : vector<16x32xf32> to vector<16xf32>
    %5 = vector.shape_cast %4 : vector<16xf32> to vector<16x1xf32>
    %cst_6 = arith.constant 3.200000e+01 : f32
    %6 = vector.broadcast %cst_6 : f32 to vector<16x1xf32>
    %7 = arith.divf %5, %6 : vector<16x1xf32>
    %8 = vector.broadcast %7 : vector<16x1xf32> to vector<16x32xf32>
    %9 = arith.subf %1, %8 : vector<16x32xf32>
    %10 = arith.mulf %9, %9 : vector<16x32xf32>
    %cst_7 = arith.constant dense<0.000000e+00> : vector<16xf32>
    %11 = vector.multi_reduction <add>, %10, %cst_7 [1] : vector<16x32xf32> to vector<16xf32>
    %12 = vector.shape_cast %11 : vector<16xf32> to vector<16x1xf32>
    %cst_8 = arith.constant 3.200000e+01 : f32
    %13 = vector.broadcast %cst_8 : f32 to vector<16x1xf32>
    %14 = arith.divf %12, %13 : vector<16x1xf32>
    %15 = vector.broadcast %7 : vector<16x1xf32> to vector<16x32xf32>
    %16 = arith.subf %1, %15 : vector<16x32xf32>
    %cst_9 = arith.constant 9.99999974E-6 : f32
    %17 = vector.broadcast %cst_9 : f32 to vector<16x1xf32>
    %18 = arith.addf %14, %17 : vector<16x1xf32>
    %19 = math.rsqrt %18 : vector<16x1xf32>
    %20 = vector.broadcast %19 : vector<16x1xf32> to vector<16x32xf32>
    %21 = arith.mulf %16, %20 : vector<16x32xf32>
    %22 = vector.broadcast %2 : vector<1x32xf32> to vector<16x32xf32>
    %23 = arith.mulf %21, %22 : vector<16x32xf32>
    %24 = vector.broadcast %3 : vector<1x32xf32> to vector<16x32xf32>
    %25 = arith.addf %23, %24 : vector<16x32xf32>
    %c0_10 = arith.constant 0 : index
    %c0_11 = arith.constant 0 : index
    %26 = vector.load %arg4[%c0_10, %c0_11] : memref<32x96xf32, #tpu.memory_space<vmem>>, vector<32x96xf32>
    %cst_12 = arith.constant dense<0.000000e+00> : vector<16x96xf32>
    %27 = tpu.matmul %25, %26, %cst_12 {dimension_numbers = #tpu.dot_dimension_numbers<[1], [0], [0], [1], [0, 0, 1, 1], [], []>} : vector<16x32xf32>, vector<32x96xf32>, vector<16x96xf32> -> vector<16x96xf32>
    %c0_13 = arith.constant 0 : index
    %c0_14 = arith.constant 0 : index
    %28 = vector.load %arg5[%c0_13, %c0_14] : memref<1x96xf32, #tpu.memory_space<vmem>>, vector<1x96xf32>
    %29 = vector.broadcast %28 : vector<1x96xf32> to vector<16x96xf32>
    %30 = arith.addf %27, %29 : vector<16x96xf32>
    %cst_15 = arith.constant 0.000000e+00 : f32
    %31 = vector.broadcast %cst_15 : f32 to vector<16x32xf32>
    %32 = vector.extract_strided_slice %30 {offsets = [0, 0], sizes = [16, 8], strides = [1, 1]} : vector<16x96xf32> to vector<16x8xf32>
    %33 = vector.extract_strided_slice %30 {offsets = [0, 32], sizes = [16, 8], strides = [1, 1]} : vector<16x96xf32> to vector<16x8xf32>
    %34 = vector.extract_strided_slice %30 {offsets = [0, 64], sizes = [16, 8], strides = [1, 1]} : vector<16x96xf32> to vector<16x8xf32>
    %cst_16 = arith.constant dense<0.000000e+00> : vector<16x16xf32>
    %35 = tpu.matmul %32, %33, %cst_16 {dimension_numbers = #tpu.dot_dimension_numbers<[1], [1], [0], [0], [0, 0, 1, 0], [], []>} : vector<16x8xf32>, vector<16x8xf32>, vector<16x16xf32> -> vector<16x16xf32>
    %cst_17 = arith.constant 0.353553385 : f32
    %36 = vector.broadcast %cst_17 : f32 to vector<16x16xf32>
    %37 = arith.mulf %35, %36 : vector<16x16xf32>
    %cst_18 = arith.constant dense<0xFF800000> : vector<16xf32>
    %38 = vector.multi_reduction <maximumf>, %37, %cst_18 [1] : vector<16x16xf32> to vector<16xf32>
    %39 = vector.shape_cast %38 : vector<16xf32> to vector<16x1xf32>
    %40 = vector.broadcast %39 : vector<16x1xf32> to vector<16x16xf32>
    %41 = arith.subf %37, %40 : vector<16x16xf32>
    %42 = math.exp %41 : vector<16x16xf32>
    %cst_19 = arith.constant dense<0.000000e+00> : vector<16xf32>
    %43 = vector.multi_reduction <add>, %42, %cst_19 [1] : vector<16x16xf32> to vector<16xf32>
    %44 = vector.shape_cast %43 : vector<16xf32> to vector<16x1xf32>
    %45 = tpu.reciprocal %44 {approx = true} : vector<16x1xf32> -> vector<16x1xf32>
    %46 = vector.broadcast %45 : vector<16x1xf32> to vector<16x16xf32>
    %47 = arith.mulf %42, %46 : vector<16x16xf32>
    %cst_20 = arith.constant dense<0.000000e+00> : vector<16x8xf32>
    %48 = tpu.matmul %47, %34, %cst_20 {dimension_numbers = #tpu.dot_dimension_numbers<[1], [0], [0], [1], [0, 0, 1, 1], [], []>} : vector<16x16xf32>, vector<16x8xf32>, vector<16x8xf32> -> vector<16x8xf32>
    %c0_21 = arith.constant 0 : index
    %c0_22 = arith.constant 0 : index
    %49 = vector.load %arg6[%c0_21, %c0_22] : memref<32x32xf32, #tpu.memory_space<vmem>>, vector<8x32xf32>
    %cst_23 = arith.constant dense<0.000000e+00> : vector<16x32xf32>
    %50 = tpu.matmul %48, %49, %cst_23 {dimension_numbers = #tpu.dot_dimension_numbers<[1], [0], [0], [1], [0, 0, 1, 1], [], []>} : vector<16x8xf32>, vector<8x32xf32>, vector<16x32xf32> -> vector<16x32xf32>
    %51 = arith.addf %31, %50 : vector<16x32xf32>
    %52 = vector.extract_strided_slice %30 {offsets = [0, 8], sizes = [16, 8], strides = [1, 1]} : vector<16x96xf32> to vector<16x8xf32>
    %53 = vector.extract_strided_slice %30 {offsets = [0, 40], sizes = [16, 8], strides = [1, 1]} : vector<16x96xf32> to vector<16x8xf32>
    %54 = vector.extract_strided_slice %30 {offsets = [0, 72], sizes = [16, 8], strides = [1, 1]} : vector<16x96xf32> to vector<16x8xf32>
    %cst_24 = arith.constant dense<0.000000e+00> : vector<16x16xf32>
    %55 = tpu.matmul %52, %53, %cst_24 {dimension_numbers = #tpu.dot_dimension_numbers<[1], [1], [0], [0], [0, 0, 1, 0], [], []>} : vector<16x8xf32>, vector<16x8xf32>, vector<16x16xf32> -> vector<16x16xf32>
    %cst_25 = arith.constant 0.353553385 : f32
    %56 = vector.broadcast %cst_25 : f32 to vector<16x16xf32>
    %57 = arith.mulf %55, %56 : vector<16x16xf32>
    %cst_26 = arith.constant dense<0xFF800000> : vector<16xf32>
    %58 = vector.multi_reduction <maximumf>, %57, %cst_26 [1] : vector<16x16xf32> to vector<16xf32>
    %59 = vector.shape_cast %58 : vector<16xf32> to vector<16x1xf32>
    %60 = vector.broadcast %59 : vector<16x1xf32> to vector<16x16xf32>
    %61 = arith.subf %57, %60 : vector<16x16xf32>
    %62 = math.exp %61 : vector<16x16xf32>
    %cst_27 = arith.constant dense<0.000000e+00> : vector<16xf32>
    %63 = vector.multi_reduction <add>, %62, %cst_27 [1] : vector<16x16xf32> to vector<16xf32>
    %64 = vector.shape_cast %63 : vector<16xf32> to vector<16x1xf32>
    %65 = tpu.reciprocal %64 {approx = true} : vector<16x1xf32> -> vector<16x1xf32>
    %66 = vector.broadcast %65 : vector<16x1xf32> to vector<16x16xf32>
    %67 = arith.mulf %62, %66 : vector<16x16xf32>
    %cst_28 = arith.constant dense<0.000000e+00> : vector<16x8xf32>
    %68 = tpu.matmul %67, %54, %cst_28 {dimension_numbers = #tpu.dot_dimension_numbers<[1], [0], [0], [1], [0, 0, 1, 1], [], []>} : vector<16x16xf32>, vector<16x8xf32>, vector<16x8xf32> -> vector<16x8xf32>
    %c8 = arith.constant 8 : index
    %c0_29 = arith.constant 0 : index
    %69 = vector.load %arg6[%c8, %c0_29] : memref<32x32xf32, #tpu.memory_space<vmem>>, vector<8x32xf32>
    %cst_30 = arith.constant dense<0.000000e+00> : vector<16x32xf32>
    %70 = tpu.matmul %68, %69, %cst_30 {dimension_numbers = #tpu.dot_dimension_numbers<[1], [0], [0], [1], [0, 0, 1, 1], [], []>} : vector<16x8xf32>, vector<8x32xf32>, vector<16x32xf32> -> vector<16x32xf32>
    %71 = arith.addf %51, %70 : vector<16x32xf32>
    %72 = vector.extract_strided_slice %30 {offsets = [0, 16], sizes = [16, 8], strides = [1, 1]} : vector<16x96xf32> to vector<16x8xf32>
    %73 = vector.extract_strided_slice %30 {offsets = [0, 48], sizes = [16, 8], strides = [1, 1]} : vector<16x96xf32> to vector<16x8xf32>
    %74 = vector.extract_strided_slice %30 {offsets = [0, 80], sizes = [16, 8], strides = [1, 1]} : vector<16x96xf32> to vector<16x8xf32>
    %cst_31 = arith.constant dense<0.000000e+00> : vector<16x16xf32>
    %75 = tpu.matmul %72, %73, %cst_31 {dimension_numbers = #tpu.dot_dimension_numbers<[1], [1], [0], [0], [0, 0, 1, 0], [], []>} : vector<16x8xf32>, vector<16x8xf32>, vector<16x16xf32> -> vector<16x16xf32>
    %cst_32 = arith.constant 0.353553385 : f32
    %76 = vector.broadcast %cst_32 : f32 to vector<16x16xf32>
    %77 = arith.mulf %75, %76 : vector<16x16xf32>
    %cst_33 = arith.constant dense<0xFF800000> : vector<16xf32>
    %78 = vector.multi_reduction <maximumf>, %77, %cst_33 [1] : vector<16x16xf32> to vector<16xf32>
    %79 = vector.shape_cast %78 : vector<16xf32> to vector<16x1xf32>
    %80 = vector.broadcast %79 : vector<16x1xf32> to vector<16x16xf32>
    %81 = arith.subf %77, %80 : vector<16x16xf32>
    %82 = math.exp %81 : vector<16x16xf32>
    %cst_34 = arith.constant dense<0.000000e+00> : vector<16xf32>
    %83 = vector.multi_reduction <add>, %82, %cst_34 [1] : vector<16x16xf32> to vector<16xf32>
    %84 = vector.shape_cast %83 : vector<16xf32> to vector<16x1xf32>
    %85 = tpu.reciprocal %84 {approx = true} : vector<16x1xf32> -> vector<16x1xf32>
    %86 = vector.broadcast %85 : vector<16x1xf32> to vector<16x16xf32>
    %87 = arith.mulf %82, %86 : vector<16x16xf32>
    %cst_35 = arith.constant dense<0.000000e+00> : vector<16x8xf32>
    %88 = tpu.matmul %87, %74, %cst_35 {dimension_numbers = #tpu.dot_dimension_numbers<[1], [0], [0], [1], [0, 0, 1, 1], [], []>} : vector<16x16xf32>, vector<16x8xf32>, vector<16x8xf32> -> vector<16x8xf32>
    %c16 = arith.constant 16 : index
    %c0_36 = arith.constant 0 : index
    %89 = vector.load %arg6[%c16, %c0_36] : memref<32x32xf32, #tpu.memory_space<vmem>>, vector<8x32xf32>
    %cst_37 = arith.constant dense<0.000000e+00> : vector<16x32xf32>
    %90 = tpu.matmul %88, %89, %cst_37 {dimension_numbers = #tpu.dot_dimension_numbers<[1], [0], [0], [1], [0, 0, 1, 1], [], []>} : vector<16x8xf32>, vector<8x32xf32>, vector<16x32xf32> -> vector<16x32xf32>
    %91 = arith.addf %71, %90 : vector<16x32xf32>
    %92 = vector.extract_strided_slice %30 {offsets = [0, 24], sizes = [16, 8], strides = [1, 1]} : vector<16x96xf32> to vector<16x8xf32>
    %93 = vector.extract_strided_slice %30 {offsets = [0, 56], sizes = [16, 8], strides = [1, 1]} : vector<16x96xf32> to vector<16x8xf32>
    %94 = vector.extract_strided_slice %30 {offsets = [0, 88], sizes = [16, 8], strides = [1, 1]} : vector<16x96xf32> to vector<16x8xf32>
    %cst_38 = arith.constant dense<0.000000e+00> : vector<16x16xf32>
    %95 = tpu.matmul %92, %93, %cst_38 {dimension_numbers = #tpu.dot_dimension_numbers<[1], [1], [0], [0], [0, 0, 1, 0], [], []>} : vector<16x8xf32>, vector<16x8xf32>, vector<16x16xf32> -> vector<16x16xf32>
    %cst_39 = arith.constant 0.353553385 : f32
    %96 = vector.broadcast %cst_39 : f32 to vector<16x16xf32>
    %97 = arith.mulf %95, %96 : vector<16x16xf32>
    %cst_40 = arith.constant dense<0xFF800000> : vector<16xf32>
    %98 = vector.multi_reduction <maximumf>, %97, %cst_40 [1] : vector<16x16xf32> to vector<16xf32>
    %99 = vector.shape_cast %98 : vector<16xf32> to vector<16x1xf32>
    %100 = vector.broadcast %99 : vector<16x1xf32> to vector<16x16xf32>
    %101 = arith.subf %97, %100 : vector<16x16xf32>
    %102 = math.exp %101 : vector<16x16xf32>
    %cst_41 = arith.constant dense<0.000000e+00> : vector<16xf32>
    %103 = vector.multi_reduction <add>, %102, %cst_41 [1] : vector<16x16xf32> to vector<16xf32>
    %104 = vector.shape_cast %103 : vector<16xf32> to vector<16x1xf32>
    %105 = tpu.reciprocal %104 {approx = true} : vector<16x1xf32> -> vector<16x1xf32>
    %106 = vector.broadcast %105 : vector<16x1xf32> to vector<16x16xf32>
    %107 = arith.mulf %102, %106 : vector<16x16xf32>
    %cst_42 = arith.constant dense<0.000000e+00> : vector<16x8xf32>
    %108 = tpu.matmul %107, %94, %cst_42 {dimension_numbers = #tpu.dot_dimension_numbers<[1], [0], [0], [1], [0, 0, 1, 1], [], []>} : vector<16x16xf32>, vector<16x8xf32>, vector<16x8xf32> -> vector<16x8xf32>
    %c24 = arith.constant 24 : index
    %c0_43 = arith.constant 0 : index
    %109 = vector.load %arg6[%c24, %c0_43] : memref<32x32xf32, #tpu.memory_space<vmem>>, vector<8x32xf32>
    %cst_44 = arith.constant dense<0.000000e+00> : vector<16x32xf32>
    %110 = tpu.matmul %108, %109, %cst_44 {dimension_numbers = #tpu.dot_dimension_numbers<[1], [0], [0], [1], [0, 0, 1, 1], [], []>} : vector<16x8xf32>, vector<8x32xf32>, vector<16x32xf32> -> vector<16x32xf32>
    %111 = arith.addf %91, %110 : vector<16x32xf32>
    %c0_45 = arith.constant 0 : index
    %c0_46 = arith.constant 0 : index
    %112 = vector.load %arg7[%c0_45, %c0_46] : memref<1x32xf32, #tpu.memory_space<vmem>>, vector<1x32xf32>
    %113 = vector.broadcast %112 : vector<1x32xf32> to vector<16x32xf32>
    %114 = arith.addf %111, %113 : vector<16x32xf32>
    %115 = math.cos %114 : vector<16x32xf32>
    %116 = arith.mulf %1, %115 : vector<16x32xf32>
    %117 = math.sin %114 : vector<16x32xf32>
    %118 = arith.addf %116, %117 : vector<16x32xf32>
    %c0_47 = arith.constant 0 : index
    %c0_48 = arith.constant 0 : index
    %c0_49 = arith.constant 0 : index
    %119 = vector.load %arg8[%c0_47, %c0_48, %c0_49] : memref<1x16x32xf32, #tpu.memory_space<vmem>>, vector<1x16x32xf32>
    %120 = vector.shape_cast %119 : vector<1x16x32xf32> to vector<16x32xf32>
    %121 = vector.shape_cast %118 : vector<16x32xf32> to vector<1x16x32xf32>
    tpu.vector_store %arg8[%c0_47, %c0_48, %c0_49], %121 {strides = array<i32>} : memref<1x16x32xf32, #tpu.memory_space<vmem>>, vector<1x16x32xf32>,
    return
  }
  func.func @transform_0(%arg0: i32) -> (i32, i32, i32) {
    %c0_i32 = arith.constant 0 : i32
    %c0_i32_0 = arith.constant 0 : i32
    %c0_i32_1 = arith.constant 0 : i32
    return %arg0, %c0_i32, %c0_i32_0 : i32, i32, i32
  }
  func.func @transform_1(%arg0: i32) -> (i32, i32) {
    %c0_i32 = arith.constant 0 : i32
    %c0_i32_0 = arith.constant 0 : i32
    %c0_i32_1 = arith.constant 0 : i32
    return %c0_i32, %c0_i32_0 : i32, i32
  }
  func.func @transform_2(%arg0: i32) -> (i32, i32) {
    %c0_i32 = arith.constant 0 : i32
    %c0_i32_0 = arith.constant 0 : i32
    %c0_i32_1 = arith.constant 0 : i32
    return %c0_i32, %c0_i32_0 : i32, i32
  }
  func.func @transform_3(%arg0: i32) -> (i32, i32) {
    %c0_i32 = arith.constant 0 : i32
    %c0_i32_0 = arith.constant 0 : i32
    %c0_i32_1 = arith.constant 0 : i32
    return %c0_i32, %c0_i32_0 : i32, i32
  }
  func.func @transform_4(%arg0: i32) -> (i32, i32) {
    %c0_i32 = arith.constant 0 : i32
    %c0_i32_0 = arith.constant 0 : i32
    %c0_i32_1 = arith.constant 0 : i32
    return %c0_i32, %c0_i32_0 : i32, i32
  }
  func.func @transform_5(%arg0: i32) -> (i32, i32) {
    %c0_i32 = arith.constant 0 : i32
    %c0_i32_0 = arith.constant 0 : i32
    %c0_i32_1 = arith.constant 0 : i32
    return %c0_i32, %c0_i32_0 : i32, i32
  }
  func.func @transform_6(%arg0: i32) -> (i32, i32) {
    %c0_i32 = arith.constant 0 : i32
    %c0_i32_0 = arith.constant 0 : i32
    %c0_i32_1 = arith.constant 0 : i32
    return %c0_i32, %c0_i32_0 : i32, i32
  }
  func.func @transform_7(%arg0: i32) -> (i32, i32, i32) {
    %c0_i32 = arith.constant 0 : i32
    %c0_i32_0 = arith.constant 0 : i32
    %c0_i32_1 = arith.constant 0 : i32
    return %arg0, %c0_i32, %c0_i32_0 : i32, i32, i32
  }
}

</mosaic_0001>

<bundles_post_ra>
// kernel: tpu_custom_call.1
= control target key start
LH: loop header
LB: loop body
LE: loop exit
PB: predicated region body
PF: predicated region fallthrough
CT: control target
= control target key end

     0   :  { %s2610_s0 = inlined_call_operand.hbm [shape: f32[2,16,32], index: 0, kind: input, shape index: {}]   ;;  %s2611_s1 = inlined_call_operand.hbm [shape: f32[1,32], index: 1, kind: input, shape index: {}]   ;;  %s2612_s2 = inlined_call_operand.vmem [shape: f32[1,32], index: 2, kind: input, shape index: {}]   ;;  %s2613_s3 = inlined_call_operand.hbm [shape: f32[32,96], index: 3, kind: input, shape index: {}]   ;;  %s2614_s4 = inlined_call_operand.vmem [shape: f32[1,96], index: 4, kind: input, shape index: {}]   ;;  %s2615_s5 = inlined_call_operand.hbm [shape: f32[32,32], index: 5, kind: input, shape index: {}]   ;;  %s2616_s6 = inlined_call_operand.vmem [shape: f32[1,32], index: 6, kind: input, shape index: {}]   ;;  %s2617_s7 = inlined_call_operand.hbm [shape: f32[2,16,32], index: 7, kind: output, shape index: {}]  }
   0x1   :  { %2620 = sst [smem:[#allocation15_spill]] %s2611_s1 }
   0x2   :  { %12 = vsyncpa [#allocation3], 0 }
   0x3   :  { %14 = vsyncpa [#allocation3 + $0x1], 0 }
   0x4   :  { %15 = vsyncpa [#allocation6], 0 }
   0x5   :  { %16 = vsyncpa [#allocation9], 0 }
   0x6   :  { %17 = vsyncpa [#allocation4], 0 }
   0x7   :  { %19 = vsyncpa [#allocation4 + $0x1], 0  ;;  %s2210_s24 = smov 0   ;;  %s2212_s25 = smov 0  }
   0x8   :  { %s2214_s26 = smov 0   ;;  %s2216_s27 = smov 0  }
   0x9 LB: > { %s2231_s28 = sadd.s32 4294967295, %s2142_s27   ;;  %s1714_s29 = sadd.s32 4294967294, %s2142_s27   ;;  %s2142_s27 = sphi %s2216_s27, %s2634_s27   ;;  %s2138_s26 = sphi %s2214_s26, %s2633_s26   ;;  %s2134_s25 = sphi %s2212_s25, %s2632_s25   ;;  %s2130_s24 = sphi %s2210_s24, %s2631_s24  }
   0xa   : > { %p45_p0 = scmp.ne.s32.totalorder %s2134_s25, %s2130_s24  ;;  %p46_p1 = scmp.eq.s32.totalorder %s2231_s28, 0 }
   0xb   : > { %p195_p2 = scmp.eq.s32.totalorder %s2231_s28, 1  ;;  %p201_p3 = scmp.eq.s32.totalorder %s1714_s29, 1 }
   0xc   : > { %p2240_p4 = por %p46_p1, %p45_p0  ;;  %p1715_p5 = scmp.ge.s32.totalorder %s2142_s27, 1 }
   0xd   : > { %p2245_p6 = por %p201_p3, %p45_p0  ;;  %p208_p7 = scmp.lt.s32.totalorder %s2142_s27, 3 }
   0xe   : > { %s2623_s1 = sld [smem:[#allocation15_spill]]  ;;  %s2144_s13 = smov [#allocation5]  }
   0xf   : > { %p2253_p8 = pnand %p1715_p5, %p208_p7  ;;  %s222_s14 = sshll.u32 %s2144_s13, 4  ;;  %s223_s14 = int_to_ptr.vmem [resolvable:$true] %s222_s14 }
  0x10   : > { %s234_s17 = sshll.u32 %s2613_s3, 4  ;;  %s2145_s19 = smov [#allocation7]   ;;  %s235_s17 = int_to_ptr.hbm [resolvable:$true] %s234_s17 }
  0x11   : > { %p1800_p10 = pneg %p2253_p8  ;;  %s236_s20 = sshll.u32 %s2145_s19, 4  ;;  %s237_s20 = int_to_ptr.vmem [resolvable:$true] %s236_s20 }
  0x12   : > { %s2618_s21 = smov 128   ;;  %s2619_s22 = smov 8  }
  0x13   : > { %p2265_p11 = pnand %p1800_p10, %p46_p1  ;;  %s251_s9 = sshll.u32 %s2615_s5, 4  ;;  %s252_s9 = int_to_ptr.hbm [resolvable:$true] %s251_s9 }
  0x14   : > { %s220_s11 = sshll.u32 %s2623_s1, 4  ;;  %s2148_s10 = smov [#allocation8]   ;;  %s221_s11 = int_to_ptr.hbm [resolvable:$true] %s220_s11 }
  0x15   : > { %1803 = dma.hbm_to_vmem [thread:$0]  (!%p2265_p11), %s221_s11, 16, %s223_s14, [#allocation6]  }
  0x16   : > { %1806 = dma.hbm_to_vmem [thread:$0]  (!%p2265_p11), %s235_s17, 512, %s237_s20, [#allocation6], %s2618_s21, %s2618_s21, %s2619_s22  }
  0x17   : > { %s253_s11 = sshll.u32 %s2148_s10, 4  ;;  %s2285_s13 = sadd.s32 1, %s2142_s27   ;;  %s254_s11 = int_to_ptr.vmem [resolvable:$true] %s253_s11 }
  0x18   : > { %1809 = dma.hbm_to_vmem [thread:$0]  (!%p2265_p11), %s252_s9, 512, %s254_s11, [#allocation9], %s2618_s21, %s2618_s21, %s2619_s22  }
  0x19   : > { %s29_s14 = ssub.s32 %s2142_s27, %s2285_s13  ;;  %s32_s15 = sadd.s32 1, %s2138_s26 }
  0x1a   : > { %p30_p12 = scmp.eq.s32.totalorder %s29_s14, 0  ;;  %p39_p13 = scmp.ne.s32.totalorder %s2138_s26, %s2134_s25 }
  0x1b   : > { %p40_p0 = scmp.eq.s32.totalorder %s2142_s27, 0  ;;  %p1821_p5 = scmp.lt.s32.totalorder %s2142_s27, 2 }
  0x1c   : > { %s2294_s16 = scalar_select %p30_p12, %s2138_s26, %s32_s15  }
  0x1d   : > { %p2298_p3 = por %p195_p2, %p39_p13  ;;  %s270_s18 = sand.u32 1, %s2138_s26  }
  0x1e   : > { %s1780_s19 = sshll.u32 %s2142_s27, 4  ;;  %p41_p7 = por %p40_p0, %p39_p13 }
  0x1f   : > { %s1720_s20 = sshll.u32 %s270_s18, 4  ;;  %s279_s9 = scalar_lea.hbm %s2610_s0, %s1780_s19 }
  0x20   : > { %s280_s10 = sshll.u32 %s279_s9, 4  ;;  %s274_s11 = scalar_lea.vmem [#allocation2], %s1720_s20  ;;  %s281_s10 = int_to_ptr.hbm [resolvable:$true] %s280_s10 }
  0x21   : > { %s282_s14 = sshll.u32 %s274_s11, 4  ;;  %p2308_p10 = pnand %p1821_p5, %p41_p7  ;;  %s283_s14 = int_to_ptr.vmem [resolvable:$true] %s282_s14 }
  0x22   : > { %s271_s21 = scalar_lea.sflag [#allocation3], %s270_s18  ;;  %s2038_s22 = sshra.s32 %s281_s10, 4  ;;  %s2039_s22 = int_to_ptr.hbm [resolvable:$true] %s2038_s22 }
  0x23   : > { %s2040_s1 = scalar_lea.hbm %s2039_s22, 16  ;;  %p2042_p11 = pneg %p2308_p10 }
  0x24   : > { %p2041_p2 = scmp.ne.s32.totalorder %s2039_s22, %s2040_s1  ;;  %s2045_s20 = scalar_lea.hbm %s2610_s0, 32 }
  0x25   : > { %p2046_p0 = scmp.lt.s32.totalorder %s2039_s22, %s2610_s0  ;;  %p2047_p5 = scmp.lt.s32.totalorder %s2045_s20, %s2040_s1 }
  0x26   : > { %p2043_p12 = pnand %p2042_p11, %p2041_p2 }
  0x27   : > { %p2048_p7 = por %p2047_p5, %p2046_p0 }
  0x28   : > { %p2044_p13 = pneg %p2043_p12 }
  0x2a   : > { %p2049_p9 = pnand %p2048_p7, %p2044_p13 }
  0x2c   : > { %2052 = shalt.err (!%p2049_p9)
}
  0x2d   : > { %s2628_s18 = smov 8   ;;  %s2629_s11 = smov 128  }
  0x2e   : > { %1813 = dma.hbm_to_vmem [thread:$0]  (!%p2308_p10), %s281_s10, 256, %s283_s14, %s271_s21, %s2629_s11, %s2629_s11, %s2628_s18  }
  0x2f   : > { %294 = sbr.rel (%p2253_p8) target bundleno = 1883 (0x75b), region = 48  ;;  %s2328_s19 = sand.u32 (!%p2253_p8), 1, %s2134_s25  }
  0x30   : > { %s1724_s1 = sshll.u32 (!%p2253_p8), %s2328_s19, 4  ;;  %s297_s22 = scalar_lea.sflag (!%p2253_p8), [#allocation3], %s2328_s19 }
  0x31   : > { %s2334_s23 = scalar_lea.vmem (!%p2253_p8), [#allocation2], %s1724_s1 }
  0x34   : > { %2113 = dma.done.wait (%p2240_p4), %s297_s22, 256  }
  0x35   : > { %2115 = vsyncadd (%p2240_p4), %s297_s22, 4294967040 }
  0x36   : > { %2117 = dma.done.wait (%p46_p1), [#allocation6], 528  }
  0x37   : > { %2119 = vsyncadd (%p46_p1), [#allocation6], 4294966768 }
  0x38   : > { %2121 = dma.done.wait (%p46_p1), [#allocation9], 512  }
  0x39   : > { %2123 = vsyncadd (%p46_p1), [#allocation9], 4294966784  ;;  %vm351_vm0 = vcmask 261120   ;;  %v347_v0 = vld [vmem:[%s2334_s23] sm:$0xff]  ;;  %v348_v2 = vld [vmem:[%s2334_s23 + $0x8] sm:$0xff]  ;;  %v2149_v4 = vmov 32.0  }
  0x3a   : > { %v352_v1 = vsel %vm351_vm0, %v347_v0, 0.0  ;;  %v355_v3 = vsel %vm351_vm0, %v348_v2, 0.0  ;;  %1908 = vrcp.f32 %v2149_v4  ;;  %v416_v21 = vld [vmem:[#allocation7 + $0x18] sm:$0xff]  ;;  %v415_v22 = vld [vmem:[#allocation7 + $0x10] sm:$0xff]  ;;  %v414_v23 = vld [vmem:[#allocation7 + $0x8] sm:$0xff]  ;;  %s2150_s14 = smov 96  }
  0x3b   : > { %353 = vadd.xlane.f32.xlu0 %v352_v1  ;;  %439 = vmatpush.msra.mxu0 %v416_v21  ;;  %v413_v24 = vld [vmem:[#allocation7] sm:$0xff]  ;;  %v1904_v39 = vld [vmem:[#allocation5] ss:$0 sm:$0xff]  ;;  %vm456_vm8 = vcmask 64512   ;;  %vm490_vm9 = vcmask 130048   ;;  %s2151_s15 = smov 64  }
  0x3c   : > { %v1905_v43 = vld [vmem:[%s2612_s2] ss:$0 sm:$0xff]  ;;  %s2152_s20 = smov 88   ;;  %s2153_s29 = smov 120  }
  0x3d   : > { %440 = vmatpush.msra.mxu0 %v415_v22  ;;  %v1906_v54 = vld [vmem:[%s2614_s4] ss:$0 sm:$0xff]  ;;  %s2154_s9 = smov 80   ;;  %s2155_s18 = smov 112  }
  0x3e   : > { %s2156_s11 = smov 104   ;;  %s2157_s22 = smov 72  }
  0x3f   : > { %441 = vmatpush.msra.mxu0 %v414_v23  ;;  %s2158_s30 = smov 56   ;;  %s2159_s12 = smov 48  }
  0x40   : > { %v1909_v5 = vpop.eup %1908  ;;  %s2160_s21 = smov 40   ;;  %s2088_s10 = scalar_lea.hbm %s2617_s7, 32 }
  0x41   : > { %v359_v6 = vmul.f32 32.0, %v1909_v5  ;;  %vm363_vm1 = vweird.f32 %v1909_v5  ;;  %442 = vmatpush.msra.mxu0 %v413_v24 }
  0x43   : > { %356 = vadd.xlane.f32.xlu0 %v355_v3  ;;  %v360_v7 = vsub.f32 1.0, %v359_v6 }
  0x45   : > { %v361_v8 = vmul.f32 %v1909_v5, %v360_v7 }
  0x47   : > { %v362_v9 = vadd.f32 %v1909_v5, %v361_v8 }
  0x49   : > { %v364_v10 = vsel %vm363_vm1, %v1909_v5, %v362_v9 }
  0xae   : > { %v354_v11 = vpop.xlane.xlu0 %353 }
  0xaf   : > { %v365_v12 = vmul.f32 %v364_v10, %v354_v11 }
  0xb1   : > { %v367_v13 = vsub.f32 %v347_v0, %v365_v12 }
  0xb3   : > { %v369_v14 = vmul.f32 %v367_v13, %v367_v13 }
  0xb5   : > { %v371_v15 = vsel %vm351_vm0, %v369_v14, 0.0 }
  0xb6   : > { %372 = vadd.xlane.f32.xlu1 %v371_v15  ;;  %v357_v16 = vpop.xlane.xlu0 %356 }
  0xb7   : > { %v366_v17 = vmul.f32 %v364_v10, %v357_v16 }
  0xb9   : > { %v368_v18 = vsub.f32 %v348_v2, %v366_v17  ;;  %v548_v17 = vld [vmem:[#allocation8] sm:$0xff] }
  0xbb   : > { %v370_v19 = vmul.f32 %v368_v18, %v368_v18 }
  0xbd   : > { %v374_v20 = vsel %vm351_vm0, %v370_v19, 0.0 }
  0xbe   : > { %375 = vadd.xlane.f32.xlu1 %v374_v20 }
 0x129   : > { %v373_v25 = vpop.xlane.xlu1 %372 }
 0x12a   : > { %v377_v26 = vmul.f32 %v373_v25, %v364_v10 }
 0x12c   : > { %v379_v27 = vadd.f32 1e-05, %v377_v26 }
 0x12e   : > { %1910 = vrsqrt.f32 %v379_v27  ;;  %vm387_vm3 = vweird.f32 %v379_v27 }
 0x131   : > { %v376_v28 = vpop.xlane.xlu1 %375 }
 0x132   : > { %v378_v29 = vmul.f32 %v376_v28, %v364_v10 }
 0x134   : > { %v1911_v30 = vpop.eup %1910  ;;  %v380_v31 = vadd.f32 1e-05, %v378_v29 }
 0x135   : > { %v382_v32 = vmul.f32 %v1911_v30, %v379_v27  ;;  %vm388_vm2 = vweird.f32 %v1911_v30 }
 0x136   : > { %1912 = vrsqrt.f32 %v380_v31  ;;  %vm389_vm4 = vmor %vm387_vm3, %vm388_vm2  ;;  %vm397_vm6 = vweird.f32 %v380_v31 }
 0x137   : > { %v383_v33 = vmul.f32 %v1911_v30, %v382_v32 }
 0x139   : > { %v384_v34 = vmul.f32 0.5, %v383_v33 }
 0x13b   : > { %v385_v35 = vsub.f32 1.5, %v384_v34 }
 0x13c   : > { %v1913_v36 = vpop.eup %1912 }
 0x13d   : > { %v386_v37 = vmul.f32 %v1911_v30, %v385_v35  ;;  %v392_v38 = vmul.f32 %v1913_v36, %v380_v31  ;;  %vm398_vm5 = vweird.f32 %v1913_v36 }
 0x13e   : > { %vm399_vm7 = vmor %vm397_vm6, %vm398_vm5 }
 0x13f   : > { %v390_v40 = vsel %vm389_vm4, %v1911_v30, %v386_v37  ;;  %v393_v41 = vmul.f32 %v1913_v36, %v392_v38 }
 0x140   : > { %v401_v42 = vmul.f32 %v390_v40, %v367_v13 }
 0x141   : > { %v394_v44 = vmul.f32 0.5, %v393_v41 }
 0x142   : > { %v406_v45 = vmul.f32 %v1904_v39, %v401_v42 }
 0x143   : > { %v395_v46 = vsub.f32 1.5, %v394_v44 }
 0x144   : > { %v411_v47 = vadd.f32 %v1905_v43, %v406_v45 }
 0x145   : > { %v396_v48 = vmul.f32 %v1913_v36, %v395_v46 }
 0x146   : > { %1729 = vmatmul.msk.f32.vlgmr.msra.gmra.mxu0 %vm351_vm0, %v411_v47 }
 0x147   : > { %v400_v49 = vsel %vm399_vm7, %v1913_v36, %v396_v48 }
 0x148   : > { %v402_v50 = vmul.f32 %v400_v49, %v368_v18 }
 0x14a   : > { %v407_v51 = vmul.f32 %v1904_v39, %v402_v50 }
 0x14c   : > { %v412_v52 = vadd.f32 %v1905_v43, %v407_v51 }
 0x14e   : > { %1730 = vmatmul.msk.f32.gmra.mxu0 %vm351_vm0, %v412_v52 }
 0x1c3   : > { %v444_v53 = vpop.f32.mrf.mxu0 }
 0x1c4   : > { %v445_v57 = vadd.f32 %v1906_v54, %v444_v53 }
 0x1cb   : > { %v447_v55 = vpop.f32.mrf.mxu0 }
 0x1cc   : > { %v448_v56 = vadd.f32 %v1906_v54, %v447_v55 }
 0x1ce   : > { %454 = vrot.lane.b32.xlu2 %v448_v56, %s2150_s14  ;;  %v2368_v2 = vpack.i.bf16 %v445_v57, %v448_v56 }
 0x1d6   : > { %452 = vrot.lane.b32.xlu2 %v445_v57, %s2150_s14 }
 0x228   : > { %v455_v58 = vpop.permute.xlu2 %454 }
 0x229   : > { %1731 = vmatpush.xpose.msk.msra.mxu1 %vm456_vm8, %v455_v58 }
 0x230   : > { %v453_v59 = vpop.permute.xlu2 %452 }
 0x231   : > { %1732 = vmatpush.xpose.msk.msra.mxu1 %vm456_vm8, %v453_v59 }
 0x234   : > { %1733 = vmatmul.msk.f32.vlgmr.msra.gmra.mxu1 %vm456_vm8, %v445_v57 }
 0x235   : > { %698 = vmatpush.msrb.mxu1 %v548_v17 }
 0x23c   : > { %1734 = vmatmul.msk.f32.gmra.mxu1 %vm456_vm8, %v448_v56 }
 0x2b1   : > { %v482_v60 = vpop.f32.mrf.mxu1 }
 0x2b2   : > { %v488_v61 = vmul.f32 0.35355338, %v482_v60 }
 0x2b4   : > { %v491_v62 = vsel %vm490_vm9, %v488_v61, -inf }
 0x2b5   : > { %492 = vmax.xlane.f32.xlu0 %v491_v62 }
 0x2b9   : > { %v485_v63 = vpop.f32.mrf.mxu1 }
 0x2ba   : > { %v489_v0 = vmul.f32 0.35355338, %v485_v63 }
 0x2bc   : > { %v494_v1 = vsel %vm490_vm9, %v489_v0, -inf }
 0x2bd   : > { %495 = vmax.xlane.f32.xlu1 %v494_v1 }
 0x2d6   : > { %1885 = vrot.lane.b32.xlu1 %v2368_v2, %s2151_s15  ;;  %s2565_s15 = scalar_lea.vmem [#allocation10], %s1724_s1  ;;  %s1781_s1 = sshll.u32 %s2231_s28, 4 }
 0x2d7   : > { %s1609_s28 = sshll.u32 %s2565_s15, 4  ;;  %s1610_s28 = int_to_ptr.vmem [resolvable:$true] %s1609_s28 }
 0x2de   : > { %553 = vrot.lane.b32.xlu1 %v445_v57, %s2152_s20 }
 0x2e6   : > { %551 = vrot.lane.b32.xlu1 %v448_v56, %s2153_s29 }
 0x2ee   : > { %710 = vrot.lane.b32.xlu1 %v445_v57, %s2154_s9 }
 0x2f6   : > { %706 = vrot.lane.b32.xlu1 %v445_v57, %s2155_s18 }
 0x2fe   : > { %708 = vrot.lane.b32.xlu1 %v448_v56, %s2155_s18 }
 0x328   : > { %v493_v3 = vpop.xlane.xlu0 %492 }
 0x329   : > { %v497_v4 = vsub.f32 %v488_v61, %v493_v3 }
 0x32b   : > { %v499_v5 = vmul.f32 1.442695, %v497_v4 }
 0x32d   : > { %1914 = vpow2.f32 %v499_v5 }
 0x330   : > { %v496_v6 = vpop.xlane.xlu1 %495 }
 0x331   : > { %v498_v7 = vsub.f32 %v489_v0, %v496_v6 }
 0x333   : > { %v1915_v8 = vpop.eup %1914  ;;  %v501_v9 = vmul.f32 1.442695, %v498_v7 }
 0x334   : > { %v503_v10 = vsel %vm490_vm9, %v1915_v8, 0.0 }
 0x335   : > { %1916 = vpow2.f32 %v501_v9  ;;  %504 = vadd.xlane.f32.xlu2 %v503_v10 }
 0x33b   : > { %v1917_v11 = vpop.eup %1916 }
 0x33c   : > { %v506_v12 = vsel %vm490_vm9, %v1917_v11, 0.0 }
 0x33d   : > { %507 = vadd.xlane.f32.xlu0 %v506_v12 }
 0x348   : > { %v1886_v13 = vpop.permute.xlu1 %1885 }
 0x349   : > { %v1887_v14 = vunpack.i.l.bf16 %v1886_v13  ;;  %v1888_v15 = vunpack.i.h.bf16 %v1886_v13 }
 0x34b   : > { %539 = vmatpush.msrb.mxu0 %v1887_v14  ;;  %1782 = vmatpush.msra.mxu2 %v1887_v14 }
 0x34d   : > { %712 = vrot.lane.b32.xlu2 %v448_v56, %s2154_s9  ;;  %540 = vmatpush.msrb.mxu0 %v1888_v15  ;;  %s1608_s9 = scalar_lea.hbm %s2617_s7, %s1781_s1 }
 0x34e   : > { %1783 = vmatpush.msra.mxu2 %v1888_v15  ;;  %s1611_s18 = sshll.u32 %s1608_s9, 4  ;;  %s1612_s18 = int_to_ptr.hbm [resolvable:$true] %s1611_s18 }
 0x350   : > { %v554_v22 = vpop.permute.xlu1 %553 }
 0x351   : > { %555 = vrot.lane.b32.xlu0 %v448_v56, %s2152_s20 }
 0x355   : > { %838 = vrot.lane.b32.xlu2 %v448_v56, %s2156_s11 }
 0x358   : > { %v552_v24 = vpop.permute.xlu1 %551 }
 0x359   : > { %549 = vrot.lane.b32.xlu0 %v445_v57, %s2153_s29 }
 0x360   : > { %v711_v28 = vpop.permute.xlu1 %710 }
 0x361   : > { %842 = vrot.lane.b32.xlu0 %v448_v56, %s2157_s22 }
 0x368   : > { %v707_v30 = vpop.permute.xlu1 %706 }
 0x369   : > { %840 = vrot.lane.b32.xlu0 %v445_v57, %s2157_s22  ;;  %s2082_s22 = sshra.s32 %s1612_s18, 4  ;;  %s2083_s22 = int_to_ptr.hbm [resolvable:$true] %s2082_s22 }
 0x36a   : > { %p2089_p9 = scmp.lt.s32.totalorder %s2083_s22, %s2617_s7 }
 0x370   : > { %v709_v32 = vpop.permute.xlu1 %708 }
 0x371   : > { %836 = vrot.lane.b32.xlu0 %v445_v57, %s2156_s11  ;;  %s1597_s11 = scalar_lea.sflag [#allocation4], %s2328_s19 }
 0x3a8   : > { %v505_v16 = vpop.xlane.xlu2 %504 }
 0x3a9   : > { %1918 = vrcp.f32 %v505_v16 }
 0x3af   : > { %v1919_v18 = vpop.eup %1918 }
 0x3b0   : > { %v508_v19 = vpop.xlane.xlu0 %507  ;;  %v511_v20 = vmul.f32 %v1919_v18, %v1915_v8  ;;  %v713_v26 = vpop.permute.xlu2 %712 }
 0x3b1   : > { %1920 = vrcp.f32 %v508_v19 }
 0x3b2   : > { %1735 = vmatmul.msk.f32.vlgmr.msrb.gmra.mxu0 %vm490_vm9, %v511_v20 }
 0x3b7   : > { %v1921_v21 = vpop.eup %1920 }
 0x3b8   : > { %v512_v23 = vmul.f32 %v1921_v21, %v1917_v11  ;;  %v839_v36 = vpop.permute.xlu2 %838 }
 0x3ba   : > { %1736 = vmatmul.msk.f32.vlgmr.msra.gmra.mxu2 %vm490_vm9, %v512_v23 }
 0x3c3   : > { %v556_v25 = vpop.permute.xlu0 %555 }
 0x3c4   : > { %1737 = vmatpush.xpose.msk.msra.mxu3 %vm456_vm8, %v556_v25 }
 0x3c8   : > { %1738 = vmatpush.xpose.msk.msra.mxu3 %vm456_vm8, %v554_v22 }
 0x3cb   : > { %v550_v27 = vpop.permute.xlu0 %549 }
 0x3cc   : > { %1747 = vmatpush.xpose.msk.msrb.mxu3 %vm456_vm8, %v713_v26 }
 0x3cd   : > { %1739 = vmatmul.msk.f32.vlgmr.msra.gmra.mxu3 %vm456_vm8, %v550_v27 }
 0x3d0   : > { %1748 = vmatpush.xpose.msk.msrb.mxu3 %vm456_vm8, %v711_v28 }
 0x3d3   : > { %v843_v29 = vpop.permute.xlu0 %842 }
 0x3d4   : > { %1755 = vmatpush.xpose.msk.msra.mxu1 %vm456_vm8, %v843_v29 }
 0x3d5   : > { %1740 = vmatmul.msk.f32.gmra.mxu3 %vm456_vm8, %v552_v24 }
 0x3db   : > { %v841_v31 = vpop.permute.xlu0 %840 }
 0x3dc   : > { %1756 = vmatpush.xpose.msk.msra.mxu1 %vm456_vm8, %v841_v31 }
 0x3dd   : > { %1749 = vmatmul.msk.f32.vlgmr.msrb.gmra.mxu3 %vm456_vm8, %v707_v30 }
 0x3e3   : > { %v837_v35 = vpop.permute.xlu0 %836 }
 0x3e5   : > { %1750 = vmatmul.msk.f32.gmra.mxu3 %vm456_vm8, %v709_v32 }
 0x42f   : > { %v542_v33 = vpop.f32.mrf.mxu0 }
 0x430   : > { %1745 = vmatmul.msk.f32.vlgmr.msrb.gmra.mxu1 %vm456_vm8, %v542_v33 }
 0x43d   : > { %v545_v34 = vpop.f32.mrf.mxu2 }
 0x43e   : > { %1746 = vmatmul.msk.f32.gmra.mxu1 %vm456_vm8, %v545_v34 }
 0x446   : > { %1757 = vmatmul.msk.f32.vlgmr.msra.gmra.mxu1 %vm456_vm8, %v837_v35 }
 0x44e   : > { %1758 = vmatmul.msk.f32.gmra.mxu1 %vm456_vm8, %v839_v36 }
 0x450   : > { %v582_v37 = vpop.f32.mrf.mxu3 }
 0x451   : > { %v588_v38 = vmul.f32 0.35355338, %v582_v37 }
 0x453   : > { %v590_v39 = vsel %vm490_vm9, %v588_v38, -inf }
 0x454   : > { %591 = vmax.xlane.f32.xlu0 %v590_v39  ;;  %v647_v39 = vld [vmem:[#allocation8 + $0x8] sm:$0xff] }
 0x455   : > { %669 = vmatpush.msra.mxu0 %v647_v39 }
 0x458   : > { %v585_v40 = vpop.f32.mrf.mxu3 }
 0x459   : > { %v589_v41 = vmul.f32 0.35355338, %v585_v40 }
 0x45b   : > { %v593_v42 = vsel %vm490_vm9, %v589_v41, -inf }
 0x45c   : > { %594 = vmax.xlane.f32.xlu1 %v593_v42 }
 0x460   : > { %v739_v43 = vpop.f32.mrf.mxu3 }
 0x461   : > { %v745_v44 = vmul.f32 0.35355338, %v739_v43 }
 0x463   : > { %v747_v45 = vsel %vm490_vm9, %v745_v44, -inf }
 0x464   : > { %748 = vmax.xlane.f32.xlu0 %v747_v45 }
 0x468   : > { %v742_v46 = vpop.f32.mrf.mxu3 }
 0x469   : > { %v746_v47 = vmul.f32 0.35355338, %v742_v46 }
 0x46b   : > { %v750_v48 = vsel %vm490_vm9, %v746_v47, -inf }
 0x46c   : > { %751 = vmax.xlane.f32.xlu1 %v750_v48 }
 0x4ad   : > { %v2397_v49 = vpop.f32.mrf.mxu1 }
 0x4bb   : > { %v2399_v50 = vpop.f32.mrf.mxu1 }
 0x4c3   : > { %v869_v51 = vpop.f32.mrf.mxu1 }
 0x4c4   : > { %v875_v52 = vmul.f32 0.35355338, %v869_v51 }
 0x4c6   : > { %v877_v54 = vsel %vm490_vm9, %v875_v52, -inf }
 0x4c7   : > { %v592_v53 = vpop.xlane.xlu0 %591  ;;  %878 = vmax.xlane.f32.xlu2 %v877_v54 }
 0x4c8   : > { %v596_v55 = vsub.f32 %v588_v38, %v592_v53 }
 0x4ca   : > { %v598_v56 = vmul.f32 1.442695, %v596_v55 }
 0x4cb   : > { %v872_v57 = vpop.f32.mrf.mxu1 }
 0x4cc   : > { %1922 = vpow2.f32 %v598_v56  ;;  %v876_v58 = vmul.f32 0.35355338, %v872_v57  ;;  %v934_v57 = vld [vmem:[#allocation8 + $0x18] sm:$0xff] }
 0x4ce   : > { %v880_v60 = vsel %vm490_vm9, %v876_v58, -inf }
 0x4cf   : > { %v595_v59 = vpop.xlane.xlu1 %594  ;;  %881 = vmax.xlane.f32.xlu2 %v880_v60 }
 0x4d0   : > { %v597_v61 = vsub.f32 %v589_v41, %v595_v59  ;;  %v804_v41 = vld [vmem:[#allocation8 + $0x10] sm:$0xff] }
 0x4d1   : > { %826 = vmatpush.msrb.mxu0 %v804_v41 }
 0x4d2   : > { %v1923_v62 = vpop.eup %1922  ;;  %v600_v63 = vmul.f32 1.442695, %v597_v61 }
 0x4d3   : > { %v602_v0 = vsel %vm490_vm9, %v1923_v62, 0.0 }
 0x4d4   : > { %1924 = vpow2.f32 %v600_v63  ;;  %603 = vadd.xlane.f32.xlu0 %v602_v0 }
 0x4d7   : > { %v749_v1 = vpop.xlane.xlu0 %748 }
 0x4d8   : > { %v753_v3 = vsub.f32 %v745_v44, %v749_v1 }
 0x4da   : > { %v1925_v4 = vpop.eup %1924  ;;  %v755_v5 = vmul.f32 1.442695, %v753_v3  ;;  %v1907_v3 = vld [vmem:[%s2616_s6] ss:$0 sm:$0xff] }
 0x4db   : > { %v605_v6 = vsel %vm490_vm9, %v1925_v4, 0.0 }
 0x4dc   : > { %1926 = vpow2.f32 %v755_v5  ;;  %606 = vadd.xlane.f32.xlu1 %v605_v6 }
 0x4df   : > { %v752_v12 = vpop.xlane.xlu1 %751 }
 0x4e0   : > { %v754_v16 = vsub.f32 %v746_v47, %v752_v12 }
 0x4e2   : > { %v1927_v7 = vpop.eup %1926  ;;  %v757_v20 = vmul.f32 1.442695, %v754_v16 }
 0x4e3   : > { %v759_v8 = vsel %vm490_vm9, %v1927_v7, 0.0 }
 0x4e4   : > { %760 = vadd.xlane.f32.xlu1 %v759_v8 }
 0x4e7   : > { %1890 = vrot.lane.b32.xlu2 %v2368_v2, %s2158_s30  ;;  %s2084_s30 = scalar_lea.hbm %s2083_s22, 16 }
 0x4e8   : > { %p2085_p1 = scmp.ne.s32.totalorder %s2083_s22, %s2084_s30  ;;  %p2090_p10 = scmp.lt.s32.totalorder %s2088_s10, %s2084_s30 }
 0x4ea   : > { %p2086_p4 = pnand %p2085_p1, %p2298_p3  ;;  %p2091_p2 = por %p2090_p10, %p2089_p9 }
 0x4ec   : > { %p2087_p8 = pneg %p2086_p4 }
 0x4ee   : > { %p2092_p11 = pnand %p2091_p2, %p2087_p8 }
 0x4ef   : > { %1900 = vrot.lane.b32.xlu2 %v2368_v2, %s2159_s12 }
 0x53a   : > { %v879_v9 = vpop.xlane.xlu2 %878 }
 0x53b   : > { %v883_v10 = vsub.f32 %v875_v52, %v879_v9 }
 0x53d   : > { %v885_v11 = vmul.f32 1.442695, %v883_v10 }
 0x53f   : > { %1928 = vpow2.f32 %v885_v11 }
 0x542   : > { %v882_v13 = vpop.xlane.xlu2 %881 }
 0x543   : > { %v884_v14 = vsub.f32 %v876_v58, %v882_v13 }
 0x545   : > { %v1929_v15 = vpop.eup %1928  ;;  %v887_v17 = vmul.f32 1.442695, %v884_v14 }
 0x546   : > { %v889_v19 = vsel %vm490_vm9, %v1929_v15, 0.0 }
 0x547   : > { %v604_v18 = vpop.xlane.xlu0 %603  ;;  %1930 = vpow2.f32 %v887_v17  ;;  %890 = vadd.xlane.f32.xlu0 %v889_v19 }
 0x548   : > { %1932 = vrcp.f32 %v604_v18 }
 0x549   : > { %1934 = vpow2.f32 %v757_v20 }
 0x54a   : > { %v1891_v21 = vpop.permute.xlu2 %1890 }
 0x54b   : > { %v1892_v22 = vunpack.i.l.bf16 %v1891_v21  ;;  %v1893_v24 = vunpack.i.h.bf16 %v1891_v21 }
 0x54d   : > { %v1931_v23 = vpop.eup %1930  ;;  %638 = vmatpush.msrb.mxu2 %v1892_v22 }
 0x54e   : > { %v1933_v25 = vpop.eup %1932  ;;  %v892_v27 = vsel %vm490_vm9, %v1931_v23, 0.0 }
 0x54f   : > { %v607_v26 = vpop.xlane.xlu1 %606  ;;  %893 = vadd.xlane.f32.xlu1 %v892_v27  ;;  %639 = vmatpush.msrb.mxu2 %v1893_v24  ;;  %v610_v28 = vmul.f32 %v1933_v25, %v1923_v62  ;;  %v1935_v30 = vpop.eup %1934 }
 0x550   : > { %1936 = vrcp.f32 %v607_v26  ;;  %v762_v35 = vsel %vm490_vm9, %v1935_v30, 0.0 }
 0x551   : > { %1741 = vmatmul.msk.f32.vlgmr.msrb.gmra.mxu2 %vm490_vm9, %v610_v28  ;;  %v2161_v28 = vmov 683565275  }
 0x552   : > { %v1901_v29 = vpop.permute.xlu2 %1900 }
 0x553   : > { %v1902_v31 = vunpack.i.l.bf16 %v1901_v29  ;;  %v1903_v33 = vunpack.i.h.bf16 %v1901_v29 }
 0x555   : > { %795 = vmatpush.msra.mxu2 %v1902_v31 }
 0x556   : > { %v1937_v32 = vpop.eup %1936 }
 0x557   : > { %v761_v34 = vpop.xlane.xlu1 %760  ;;  %v611_v36 = vmul.f32 %v1937_v32, %v1925_v4  ;;  %763 = vadd.xlane.f32.xlu1 %v762_v35  ;;  %796 = vmatpush.msra.mxu2 %v1903_v33 }
 0x558   : > { %1938 = vrcp.f32 %v761_v34  ;;  %v2163_v34 = vmov 2131351028  }
 0x559   : > { %1742 = vmatmul.msk.f32.gmra.mxu2 %vm490_vm9, %v611_v36 }
 0x55a   : > { %956 = vmatpush.msrb.mxu2 %v934_v57 }
 0x55b   : > { %1895 = vrot.lane.b32.xlu0 %v2368_v2, %s2160_s21 }
 0x55e   : > { %v1939_v37 = vpop.eup %1938 }
 0x55f   : > { %v767_v38 = vmul.f32 %v1939_v37, %v1927_v7  ;;  %v2164_v37 = vmov 2102212464  }
 0x561   : > { %1751 = vmatmul.msk.f32.vlgmr.msra.gmra.mxu2 %vm490_vm9, %v767_v38 }
 0x5ba   : > { %v891_v42 = vpop.xlane.xlu0 %890 }
 0x5bb   : > { %1940 = vrcp.f32 %v891_v42 }
 0x5c1   : > { %v1941_v45 = vpop.eup %1940 }
 0x5c2   : > { %v894_v40 = vpop.xlane.xlu1 %893  ;;  %v897_v48 = vmul.f32 %v1941_v45, %v1929_v15 }
 0x5ca   : > { %v764_v43 = vpop.xlane.xlu1 %763 }
 0x5cb   : > { %1942 = vrcp.f32 %v764_v43  ;;  %v2166_v43 = vmov 1326507024  }
 0x5cc   : > { %1944 = vrcp.f32 %v894_v40  ;;  %v2165_v40 = vmov 920167782  }
 0x5cd   : > { %v1896_v44 = vpop.permute.xlu0 %1895 }
 0x5ce   : > { %v1897_v46 = vunpack.i.l.bf16 %v1896_v44  ;;  %v1898_v47 = vunpack.i.h.bf16 %v1896_v44 }
 0x5d0   : > { %925 = vmatpush.msra.mxu3 %v1897_v46 }
 0x5d1   : > { %v1943_v2 = vpop.eup %1942 }
 0x5d2   : > { %926 = vmatpush.msra.mxu3 %v1898_v47  ;;  %v768_v51 = vmul.f32 %v1943_v2, %v1935_v30  ;;  %v1945_v53 = vpop.eup %1944  ;;  %v2162_v30 = vmov 2475754826  }
 0x5d3   : > { %1759 = vmatmul.msk.f32.vlgmr.msra.gmra.mxu3 %vm490_vm9, %v897_v48  ;;  %v898_v54 = vmul.f32 %v1945_v53, %v1931_v23 }
 0x5d4   : > { %v641_v52 = vpop.f32.mrf.mxu2  ;;  %1752 = vmatmul.msk.f32.gmra.mxu2 %vm490_vm9, %v768_v51 }
 0x5d5   : > { %1743 = vmatmul.msk.f32.vlgmr.msra.gmra.mxu0 %vm456_vm8, %v641_v52 }
 0x5db   : > { %1760 = vmatmul.msk.f32.gmra.mxu3 %vm490_vm9, %v898_v54 }
 0x5dc   : > { %v644_v55 = vpop.f32.mrf.mxu2 }
 0x5dd   : > { %1744 = vmatmul.msk.f32.gmra.mxu0 %vm456_vm8, %v644_v55 }
 0x5e4   : > { %v798_v56 = vpop.f32.mrf.mxu2 }
 0x5e5   : > { %1753 = vmatmul.msk.f32.vlgmr.msrb.gmra.mxu0 %vm456_vm8, %v798_v56 }
 0x652   : > { %v671_v61 = vpop.f32.mrf.mxu0 }
 0x653   : > { %v701_v0 = vadd.f32 %v2397_v49, %v671_v61 }
 0x656   : > { %v928_v58 = vpop.f32.mrf.mxu3 }
 0x657   : > { %v801_v59 = vpop.f32.mrf.mxu2  ;;  %1761 = vmatmul.msk.f32.vlgmr.msrb.gmra.mxu2 %vm456_vm8, %v928_v58 }
 0x658   : > { %1754 = vmatmul.msk.f32.gmra.mxu0 %vm456_vm8, %v801_v59 }
 0x65a   : > { %v674_v62 = vpop.f32.mrf.mxu0 }
 0x65b   : > { %v704_v8 = vadd.f32 %v2399_v50, %v674_v62 }
 0x65e   : > { %v931_v60 = vpop.f32.mrf.mxu3 }
 0x65f   : > { %1762 = vmatmul.msk.f32.gmra.mxu2 %vm456_vm8, %v931_v60 }
 0x662   : > { %v828_v63 = vpop.f32.mrf.mxu0 }
 0x663   : > { %v834_v1 = vadd.f32 %v828_v63, %v701_v0 }
 0x6d5   : > { %v831_v7 = vpop.f32.mrf.mxu0 }
 0x6d6   : > { %v835_v11 = vadd.f32 %v831_v7, %v704_v8 }
 0x6da   : > { %v958_v4 = vpop.f32.mrf.mxu2 }
 0x6db   : > { %v964_v5 = vadd.f32 %v958_v4, %v834_v1 }
 0x6dd   : > { %v2428_v6 = vadd.f32 %v1907_v3, %v964_v5 }
 0x6df   : > { %v972_v9 = vand.u32 2147483647, %v2428_v6  ;;  %v975_v10 = vand.u32 2139095040, %v2428_v6 }
 0x6e1   : > { %v976_v12 = vshrl.u32 %v975_v10, 23  ;;  %v979_v49 = vand.u32 8388607, %v972_v9 }
 0x6e2   : > { %v961_v13 = vpop.f32.mrf.mxu2 }
 0x6e3   : > { %v1763_v14 = vadd.s32 4294967169, %v976_v12  ;;  %v980_v15 = vor.u32 8388608, %v979_v49  ;;  %v965_v16 = vadd.f32 %v961_v13, %v835_v11 }
 0x6e5   : > { %v982_v17 = vadd.s32 1, %v1763_v14  ;;  %v2435_v18 = vadd.f32 %v1907_v3, %v965_v16  ;;  %v2437_v19 = vshll.u32 %v980_v15, 8 }
 0x6e7   : > { %vm983_vm10 = vcmp.gt.s32.totalorder %v982_v17, 0  ;;  %v1126_v20 = vand.u32 2147483647, %v2435_v18  ;;  %v1129_v21 = vand.u32 2139095040, %v2435_v18  ;;  %v1021_v24 = vand.u32 65535, %v2437_v19 }
 0x6e8   : > { %v984_v50 = vsel %vm983_vm10, %v982_v17, 0  ;;  %v1022_v25 = vshrl.u32 %v2437_v19, 16 }
 0x6e9   : > { %v986_v22 = vand.u32 31, %v984_v50  ;;  %v1130_v26 = vshrl.u32 %v1129_v21, 23  ;;  %v985_v27 = vshrl.u32 %v984_v50, 5  ;;  %v2447_v32 = vand.u32 8388607, %v1126_v20 }
 0x6eb   : > { %v987_v23 = vsub.s32 32, %v986_v22  ;;  %v989_v29 = vshll.u32 %v2161_v28, %v986_v22  ;;  %v992_v31 = vshll.u32 %v2162_v30, %v986_v22  ;;  %v995_v36 = vshll.u32 %v2163_v34, %v986_v22 }
 0x6ec   : > { %v998_v39 = vshll.u32 %v2164_v37, %v986_v22  ;;  %v1001_v42 = vshll.u32 %v2165_v40, %v986_v22  ;;  %v1766_v2 = vadd.s32 4294967169, %v1130_v26  ;;  %vm1004_vm11 = vcmp.lt.s32.totalorder %v985_v27, 1 }
 0x6ed   : > { %v990_v33 = vshrl.u32 %v2162_v30, %v987_v23  ;;  %v993_v35 = vshrl.u32 %v2163_v34, %v987_v23  ;;  %v996_v38 = vshrl.u32 %v2164_v37, %v987_v23  ;;  %v999_v41 = vshrl.u32 %v2165_v40, %v987_v23 }
 0x6ee   : > { %v1002_v44 = vshrl.u32 %v2166_v43, %v987_v23  ;;  %vm1007_vm12 = vcmp.lt.s32.totalorder %v985_v27, 4  ;;  %v988_v52 = vshrl.u32 %v2161_v28, %v987_v23  ;;  %vm1006_vm13 = vcmp.lt.s32.totalorder %v985_v27, 3 }
 0x6ef   : > { %v991_v45 = vor.u32 %v990_v33, %v989_v29  ;;  %v994_v46 = vor.u32 %v993_v35, %v992_v31  ;;  %v997_v47 = vor.u32 %v996_v38, %v995_v36  ;;  %v1000_v48 = vor.u32 %v999_v41, %v998_v39 }
 0x6f0   : > { %v1003_v51 = vor.u32 %v1002_v44, %v1001_v42  ;;  %v1136_v58 = vadd.s32 1, %v1766_v2  ;;  %vm1005_vm14 = vcmp.lt.s32.totalorder %v985_v27, 2  ;;  %v1134_v7 = vor.u32 8388608, %v2447_v32 }
 0x6f1   : > { %v1009_v53 = vsel %vm1007_vm12, %v997_v47, 2102212464  ;;  %v1012_v54 = vsel %vm1004_vm11, %v991_v45, %v994_v46  ;;  %v1016_v55 = vsel %vm1004_vm11, %v994_v46, %v997_v47  ;;  %v1013_v56 = vsel %vm1007_vm12, %v1000_v48, 920167782 }
 0x6f2   : > { %v1017_v57 = vsel %vm1007_vm12, %v1003_v51, 1326507024  ;;  %v1008_v59 = vsel %vm1004_vm11, %v988_v52, %v991_v45  ;;  %v1014_v60 = vsel %vm1006_vm13, %v997_v47, %v1013_v56  ;;  %v1010_v62 = vsel %vm1006_vm13, %v994_v46, %v1009_v53 }
 0x6f3   : > { %v1018_v61 = vsel %vm1006_vm13, %v1000_v48, %v1017_v57  ;;  %v1015_v63 = vsel %vm1005_vm14, %v1012_v54, %v1014_v60  ;;  %vm1137_vm15 = vcmp.gt.s32.totalorder %v1136_v58, 0  ;;  %v2459_v8 = vsel %vm1005_vm14, %v1008_v59, %v1010_v62 }
 0x6f4   : > { %v1019_v0 = vsel %vm1005_vm14, %v1016_v55, %v1018_v61  ;;  %v1045_v4 = vand.u32 65535, %v1015_v63  ;;  %v1046_v5 = vshrl.u32 %v1015_v63, 16  ;;  %v1138_v12 = vsel %vm1137_vm15, %v1136_v58, 0 }
 0x6f5   : > { %v1023_v1 = vand.u32 65535, %v1019_v0  ;;  %v1024_v3 = vshrl.u32 %v1019_v0, 16  ;;  %v1140_v32 = vand.u32 31, %v1138_v12  ;;  %v2167_v33 = vmov 0  }
 0x6f6   : > { %v1048_v14 = vmul.u32 %v1046_v5, %v1021_v24  ;;  %v1049_v15 = vmul.u32 %v1045_v4, %v1022_v25  ;;  %v1047_v50 = vmul.u32 %v1045_v4, %v1021_v24  ;;  %v1050_v21 = vmul.u32 %v1046_v5, %v1022_v25 }
 0x6f7   : > { %v1026_v10 = vmul.u32 %v1024_v3, %v1021_v24  ;;  %v1027_v11 = vmul.u32 %v1023_v1, %v1022_v25  ;;  %v1025_v49 = vmul.u32 %v1023_v1, %v1021_v24  ;;  %v1028_v13 = vmul.u32 %v1024_v3, %v1022_v25 }
 0x6f8   : > { %v1051_v26 = vshll.u32 %v1048_v14, 16  ;;  %v1052_v27 = vshrl.u32 %v1048_v14, 16  ;;  %v1053_v31 = vshll.u32 %v1049_v15, 16  ;;  %v1054_v36 = vshrl.u32 %v1049_v15, 16 }
 0x6f9   : > { %v1029_v16 = vshll.u32 %v1026_v10, 16  ;;  %v1030_v17 = vshrl.u32 %v1026_v10, 16  ;;  %v1031_v22 = vshll.u32 %v1027_v11, 16  ;;  %v1032_v23 = vshrl.u32 %v1027_v11, 16 }
 0x6fa   : > { %vm1055_vm2 = vc.u32 %v1047_v50, %v1051_v26  ;;  %v1057_v38 = vadd.s32 %v1051_v26, %v1047_v50  ;;  %v2463_v24 = vsub.s32 32, %v1140_v32  ;;  %v2466_v44 = vshrl.u32 %v1138_v12, 5 }
 0x6fb   : > { %vm1033_vm1 = vc.u32 %v1025_v49, %v1029_v16  ;;  %v1035_v29 = vadd.s32 %v1029_v16, %v1025_v49  ;;  %v1056_v41 = vsel %vm1055_vm2, 1, %v2167_v33  ;;  %v1143_v2 = vshll.u32 %v2161_v28, %v1140_v32 }
 0x6fc   : > { %v1034_v35 = vsel %vm1033_vm1, 1, %v2167_v33  ;;  %v1058_v42 = vadd.s32 %v1056_v41, %v1050_v21  ;;  %vm1059_vm4 = vc.u32 %v1057_v38, %v1053_v31  ;;  %v2469_v47 = vadd.s32 %v1057_v38, %v1053_v31 }
 0x6fd   : > { %v1036_v39 = vadd.s32 %v1034_v35, %v1028_v13  ;;  %vm1037_vm3 = vc.u32 %v1035_v29, %v1031_v22  ;;  %v1060_v46 = vsel %vm1059_vm4, 1, %v2167_v33  ;;  %v1144_v51 = vshrl.u32 %v2162_v30, %v2463_v24 }
 0x6fe   : > { %v1038_v25 = vsel %vm1037_vm3, 1, %v2167_v33  ;;  %v1062_v48 = vadd.s32 %v1060_v46, %v1058_v42  ;;  %v1146_v52 = vshll.u32 %v2162_v30, %v1140_v32  ;;  %v1147_v53 = vshrl.u32 %v2163_v34, %v2463_v24 }
 0x6ff   : > { %v1040_v45 = vadd.s32 %v1038_v25, %v1036_v39  ;;  %v1149_v55 = vshll.u32 %v2163_v34, %v1140_v32  ;;  %v1150_v56 = vshrl.u32 %v2164_v37, %v2463_v24  ;;  %v1152_v57 = vshll.u32 %v2164_v37, %v1140_v32 }
 0x700   : > { %v1063_v58 = vadd.s32 %v1062_v48, %v1052_v27  ;;  %v2481_v59 = vor.u32 %v1144_v51, %v1143_v2  ;;  %v2483_v60 = vor.u32 %v1147_v53, %v1146_v52  ;;  %v1153_v61 = vshrl.u32 %v2165_v40, %v2463_v24 }
 0x701   : > { %v1041_v54 = vadd.s32 %v1040_v45, %v1030_v17  ;;  %v1151_v62 = vor.u32 %v1150_v56, %v1149_v55  ;;  %v1155_v63 = vshll.u32 %v2165_v40, %v1140_v32  ;;  %v1156_v34 = vshrl.u32 %v2166_v43, %v2463_v24 }
 0x702   : > { %v1064_v0 = vadd.s32 %v1063_v58, %v1054_v36  ;;  %v1154_v1 = vor.u32 %v1153_v61, %v1152_v57  ;;  %vm1158_vm6 = vcmp.lt.s32.totalorder %v2466_v44, 1  ;;  %v2495_v3 = vshll.u32 %v1134_v7, 8 }
 0x703   : > { %v2487_v30 = vadd.s32 %v1041_v54, %v1032_v23  ;;  %v1157_v37 = vor.u32 %v1156_v34, %v1155_v63  ;;  %v1065_v4 = vmul.u32 %v2437_v19, %v2459_v8  ;;  %vm1161_vm7 = vcmp.lt.s32.totalorder %v2466_v44, 4 }
 0x704   : > { %v1068_v5 = vadd.s32 1, %v1064_v0  ;;  %v1166_v40 = vsel %vm1158_vm6, %v2481_v59, %v2483_v60  ;;  %vm1160_vm8 = vcmp.lt.s32.totalorder %v2466_v44, 3  ;;  %v1167_v43 = vsel %vm1161_vm7, %v1154_v1, 920167782 }
 0x705   : > { %vm1067_vm5 = vc.u32 %v2487_v30, %v2469_v47  ;;  %v1170_v7 = vsel %vm1158_vm6, %v2483_v60, %v1151_v62  ;;  %v1171_v19 = vsel %vm1161_vm7, %v1157_v37, 1326507024  ;;  %vm1159_vm9 = vcmp.lt.s32.totalorder %v2466_v44, 2 }
 0x706   : > { %v1069_v8 = vsel %vm1067_vm5, %v1068_v5, %v1064_v0  ;;  %v1168_v10 = vsel %vm1160_vm8, %v1151_v62, %v1167_v43  ;;  %v1172_v11 = vsel %vm1160_vm8, %v1154_v1, %v1171_v19  ;;  %v1175_v14 = vand.u32 65535, %v2495_v3 }
 0x707   : > { %v1070_v12 = vadd.s32 %v1069_v8, %v1065_v4  ;;  %v1169_v49 = vsel %vm1159_vm9, %v1166_v40, %v1168_v10  ;;  %v1173_v13 = vsel %vm1159_vm9, %v1170_v7, %v1172_v11  ;;  %v1176_v15 = vshrl.u32 %v2495_v3, 16 }
 0x708   : > { %v1177_v16 = vand.u32 65535, %v1173_v13  ;;  %v1178_v17 = vshrl.u32 %v1173_v13, 16  ;;  %v1200_v50 = vshrl.u32 %v1169_v49, 16  ;;  %v1199_v26 = vand.u32 65535, %v1169_v49 }
 0x709   : > { %v1071_v21 = vadd.s32 536870912, %v1070_v12  ;;  %v1142_v63 = vshrl.u32 %v2161_v28, %v2463_v24  ;;  %v1163_v34 = vsel %vm1161_vm7, %v1151_v62, 2102212464  ;;  %v1066_v62 = vadd.s32 %v2469_v47, %v2487_v30 }
 0x70a   : > { %v1180_v22 = vmul.u32 %v1178_v17, %v1175_v14  ;;  %v1181_v23 = vmul.u32 %v1177_v16, %v1176_v15  ;;  %v1202_v29 = vmul.u32 %v1200_v50, %v1175_v14  ;;  %v1179_v31 = vmul.u32 %v1177_v16, %v1175_v14 }
 0x70b   : > { %v2523_v27 = vshrl.u32 %v1071_v21, 30  ;;  %v1182_v36 = vmul.u32 %v1178_v17, %v1176_v15  ;;  %v1201_v25 = vmul.u32 %v1199_v26, %v1175_v14  ;;  %v1203_v46 = vmul.u32 %v1199_v26, %v1176_v15 }
 0x70c   : > { %v1183_v32 = vshll.u32 %v1180_v22, 16  ;;  %v1205_v38 = vshll.u32 %v1202_v29, 16  ;;  %v1185_v39 = vshll.u32 %v1181_v23, 16  ;;  %v1204_v52 = vmul.u32 %v1200_v50, %v1176_v15 }
 0x70d   : > { %v1073_v35 = vshll.u32 %v2523_v27, 30  ;;  %v1207_v56 = vshll.u32 %v1203_v46, 16  ;;  %v1184_v0 = vshrl.u32 %v1180_v22, 16  ;;  %v1162_v37 = vsel %vm1158_vm6, %v1142_v63, %v2481_v59 }
 0x70e   : > { %vm1187_vm10 = vc.u32 %v1179_v31, %v1183_v32  ;;  %v1189_v41 = vadd.s32 %v1183_v32, %v1179_v31  ;;  %vm1209_vm12 = vc.u32 %v1201_v25, %v1205_v38  ;;  %v1211_v54 = vadd.s32 %v1205_v38, %v1201_v25 }
 0x70f   : > { %v1074_v42 = vsub.s32 %v1070_v12, %v1073_v35  ;;  %v1188_v45 = vsel %vm1187_vm10, 1, %v2167_v33  ;;  %v1210_v53 = vsel %vm1209_vm12, 1, %v2167_v33  ;;  %v1186_v4 = vshrl.u32 %v1181_v23, 16 }
 0x710   : > { %v1190_v2 = vadd.s32 %v1188_v45, %v1182_v36  ;;  %vm1191_vm11 = vc.u32 %v1189_v41, %v1185_v39  ;;  %v1212_v61 = vadd.s32 %v1210_v53, %v1204_v52  ;;  %vm1213_vm14 = vc.u32 %v1211_v54, %v1207_v56 }
 0x711   : > { %vm1075_vm13 = vcmp.lt.s32.totalorder %v1074_v42, 0  ;;  %v1076_v48 = vsub.s32 0, %v1074_v42  ;;  %v1192_v51 = vsel %vm1191_vm11, 1, %v2167_v33  ;;  %v1214_v40 = vsel %vm1213_vm14, 1, %v2167_v33 }
 0x712   : > { %v1194_v58 = vadd.s32 %v1192_v51, %v1190_v2  ;;  %v1164_v43 = vsel %vm1160_vm8, %v2483_v60, %v1163_v34  ;;  %v1206_v28 = vshrl.u32 %v1202_v29, 16  ;;  %v1216_v24 = vadd.s32 %v1214_v40, %v1212_v61 }
 0x713   : > { %v1077_v55 = vsel %vm1075_vm13, %v1076_v48, %v1074_v42  ;;  %v1208_v11 = vshrl.u32 %v1203_v46, 16  ;;  %v1165_v12 = vsel %vm1159_vm9, %v1162_v37, %v1164_v43  ;;  %v1215_v33 = vadd.s32 %v1211_v54, %v1207_v56 }
 0x714   : > { %v1078_v57 = vclz %v1077_v55  ;;  %v1195_v5 = vadd.s32 %v1194_v58, %v1184_v0  ;;  %v1217_v59 = vadd.s32 %v1216_v24, %v1206_v28  ;;  %v1219_v47 = vmul.u32 %v2495_v3, %v1165_v12 }
 0x715   : > { %vm974_vm2 = vcmp.lt.s32.totalorder %v2428_v6, 0  ;;  %vm973_vm3 = vcmp.le.f32.partialorder %v972_v9, 0.7853982  ;;  %v1096_v3 = vsub.s32 4, %v2523_v27  ;;  %vm1115_vm6 = vweird.f32 %v2428_v6 }
 0x716   : > { %v1764_v1 = vadd.s32 4294967294, %v1078_v57  ;;  %v1196_v19 = vadd.s32 %v1195_v5, %v1186_v4  ;;  %v1218_v15 = vadd.s32 %v1217_v59, %v1208_v11  ;;  %vm1128_vm13 = vcmp.lt.s32.totalorder %v2435_v18, 0 }
 0x717   : > { %v1097_v45 = vsel %vm974_vm2, %v1096_v3, %v2523_v27  ;;  %vm1127_vm14 = vcmp.le.f32.partialorder %v1126_v20, 0.7853982 }
 0x718   : > { %vm1765_vm15 = vcmp.lt.s32.totalorder %v1764_v1, 0  ;;  %vm1221_vm1 = vc.u32 %v1196_v19, %v1215_v33  ;;  %v1222_v17 = vadd.s32 1, %v1218_v15  ;;  %v1099_v52 = vsel %vm973_vm3, 0, %v1097_v45 }
 0x719   : > { %v1081_v7 = vsel %vm1765_vm15, 0, %v1764_v1  ;;  %v1426_v57 = vadd.s32 3, %v1099_v52  ;;  %v1220_v34 = vadd.s32 %v1215_v33, %v1196_v19  ;;  %v1116_v4 = vand.u32 3, %v1099_v52 }
 0x71a   : > { %v1082_v8 = vsub.s32 32, %v1081_v7  ;;  %v1086_v10 = vsub.s32 4294967266, %v1081_v7  ;;  %v1083_v49 = vshll.u32 %v1074_v42, %v1081_v7  ;;  %v1223_v50 = vsel %vm1221_vm1, %v1222_v17, %v1218_v15 }
 0x71b   : > { %v1224_v21 = vadd.s32 %v1223_v50, %v1219_v47  ;;  %v1427_v40 = vand.u32 3, %v1426_v57  ;;  %vm1117_vm7 = vcmp.lt.s32.totalorder %v1116_v4, 2  ;;  %vm1118_vm8 = vcmp.eq.s32.totalorder %v1116_v4, 0 }
 0x71c   : > { %v1084_v13 = vshrl.u32 %v1066_v62, %v1082_v8  ;;  %v1087_v14 = vadd.s32 127, %v1086_v10  ;;  %vm1121_vm9 = vcmp.eq.s32.totalorder %v1116_v4, 2 }
 0x71d   : > { %v1225_v26 = vadd.s32 536870912, %v1224_v21  ;;  %vm1428_vm10 = vcmp.lt.s32.totalorder %v1427_v40, 2  ;;  %vm1429_vm11 = vcmp.eq.s32.totalorder %v1427_v40, 0  ;;  %vm1432_vm12 = vcmp.eq.s32.totalorder %v1427_v40, 2 }
 0x71e   : > { %v1085_v60 = vor.u32 %v1084_v13, %v1083_v49  ;;  %v1088_v16 = vshll.u32 %v1087_v14, 23 }
 0x71f   : > { %v2545_v44 = vshrl.u32 %v1225_v26, 30 }
 0x720   : > { %v1089_v30 = vor.u32 4788187, %v1088_v16  ;;  %v1092_v23 = vcvt.s32.f32 %v1085_v60  ;;  %v1946_v16 = vld [vmem:[%s2334_s23] sm:$0xff] }
 0x721   : > { %v1227_v32 = vshll.u32 %v2545_v44, 30 }
 0x722   : > { %v1090_v22 = vand.u32 2147483647, %v1089_v30 }
 0x723   : > { %v1228_v38 = vsub.s32 %v1224_v21, %v1227_v32 }
 0x724   : > { %v1093_v29 = vmul.f32 %v1092_v23, %v1090_v22  ;;  %v1250_v23 = vsub.s32 4, %v2545_v44 }
 0x725   : > { %vm1229_vm4 = vcmp.lt.s32.totalorder %v1228_v38, 0  ;;  %v1230_v41 = vsub.s32 0, %v1228_v38 }
 0x726   : > { %v1094_v31 = vxor.u32 2147483648, %v1093_v29  ;;  %v1251_v32 = vsel %vm1128_vm13, %v1250_v23, %v2545_v44 }
 0x727   : > { %v1231_v46 = vsel %vm1229_vm4, %v1230_v41, %v1228_v38  ;;  %v1253_v20 = vsel %vm1127_vm14, 0, %v1251_v32 }
 0x728   : > { %v1095_v35 = vsel %vm974_vm2, %v1094_v31, %v1093_v29  ;;  %v1232_v51 = vclz %v1231_v46 }
 0x729   : > { %v1098_v36 = vsel %vm973_vm3, %v2428_v6, %v1095_v35 }
 0x72a   : > { %v1100_v39 = vmul.f32 %v1098_v36, %v1098_v36  ;;  %v1767_v54 = vadd.s32 4294967294, %v1232_v51 }
 0x72c   : > { %v1101_v25 = vmul.f32 -0.001358992, %v1100_v39  ;;  %v1108_v42 = vmul.f32 -0.00019511016, %v1100_v39  ;;  %vm1768_vm5 = vcmp.lt.s32.totalorder %v1767_v54, 0 }
 0x72d   : > { %v1235_v58 = vsel %vm1768_vm5, 0, %v1767_v54 }
 0x72e   : > { %v1102_v2 = vadd.f32 0.041655596, %v1101_v25  ;;  %v1109_v48 = vadd.f32 0.008332121, %v1108_v42  ;;  %v1236_v0 = vsub.s32 32, %v1235_v58  ;;  %v1240_v1 = vsub.s32 4294967266, %v1235_v58 }
 0x72f   : > { %v1237_v43 = vshll.u32 %v1228_v38, %v1235_v58  ;;  %v1581_v25 = vadd.s32 3, %v1253_v20 }
 0x730   : > { %v1103_v53 = vmul.f32 %v1102_v2, %v1100_v39  ;;  %v1110_v9 = vmul.f32 %v1109_v48, %v1100_v39  ;;  %v1238_v5 = vshrl.u32 %v1220_v34, %v1236_v0  ;;  %v1241_v28 = vadd.s32 127, %v1240_v1 }
 0x731   : > { %v1270_v48 = vand.u32 3, %v1253_v20  ;;  %v1582_v51 = vand.u32 3, %v1581_v25 }
 0x732   : > { %v1104_v55 = vadd.f32 -0.4999988, %v1103_v53  ;;  %v1111_v56 = vadd.f32 -0.16666654, %v1110_v9  ;;  %v1239_v7 = vor.u32 %v1238_v5, %v1237_v43  ;;  %v1242_v8 = vshll.u32 %v1241_v28, 23 }
 0x733   : > { %vm1271_vm15 = vcmp.lt.s32.totalorder %v1270_v48, 2  ;;  %vm1272_vm1 = vcmp.eq.s32.totalorder %v1270_v48, 0  ;;  %vm1275_vm2 = vcmp.eq.s32.totalorder %v1270_v48, 2  ;;  %vm1583_vm3 = vcmp.lt.s32.totalorder %v1582_v51, 2 }
 0x734   : > { %v1105_v61 = vmul.f32 %v1104_v55, %v1100_v39  ;;  %v1112_v63 = vmul.f32 %v1111_v56, %v1100_v39  ;;  %v1243_v19 = vor.u32 4788187, %v1242_v8  ;;  %v1246_v15 = vcvt.s32.f32 %v1239_v7 }
 0x735   : > { %vm1584_vm4 = vcmp.eq.s32.totalorder %v1582_v51, 0  ;;  %vm1587_vm5 = vcmp.eq.s32.totalorder %v1582_v51, 2 }
 0x736   : > { %v1106_v37 = vadd.f32 1.0, %v1105_v61  ;;  %v1113_v27 = vadd.f32 1.0, %v1112_v63  ;;  %v1244_v14 = vand.u32 2147483647, %v1243_v19  ;;  %v1947_v63 = vld [vmem:[%s2334_s23 + $0x8] sm:$0xff] }
 0x738   : > { %v1114_v24 = vmul.f32 %v1113_v27, %v1098_v36  ;;  %v1122_v62 = vxor.u32 2147483648, %v1106_v37  ;;  %v1247_v47 = vmul.f32 %v1246_v15, %v1244_v14 }
 0x73a   : > { %v1119_v10 = vxor.u32 2147483648, %v1114_v24  ;;  %v1123_v59 = vsel %vm1121_vm9, %v1122_v62, %v1114_v24  ;;  %v1434_v33 = vsel %vm1432_vm12, %v1122_v62, %v1114_v24  ;;  %v1248_v21 = vxor.u32 2147483648, %v1247_v47 }
 0x73c   : > { %v1120_v11 = vsel %vm1118_vm8, %v1106_v37, %v1119_v10  ;;  %v1431_v12 = vsel %vm1429_vm11, %v1106_v37, %v1119_v10  ;;  %v1249_v22 = vsel %vm1128_vm13, %v1248_v21, %v1247_v47 }
 0x73d   : > { %v1124_v49 = vsel %vm1117_vm7, %v1120_v11, %v1123_v59  ;;  %v1435_v13 = vsel %vm1428_vm10, %v1431_v12, %v1434_v33  ;;  %v1252_v26 = vsel %vm1127_vm14, %v2435_v18, %v1249_v22 }
 0x73e   : > { %v1125_v60 = vsel %vm1115_vm6, nan, %v1124_v49  ;;  %v1436_v30 = vsel %vm1115_vm6, nan, %v1435_v13  ;;  %v1254_v6 = vmul.f32 %v1252_v26, %v1252_v26  ;;  %vm1269_vm6 = vweird.f32 %v2435_v18 }
 0x73f   : > { %v1280_v17 = vmul.f32 %v1946_v16, %v1125_v60 }
 0x740   : > { %v1255_v29 = vmul.f32 -0.001358992, %v1254_v6  ;;  %v1262_v31 = vmul.f32 -0.00019511016, %v1254_v6 }
 0x741   : > { %v1592_v50 = vadd.f32 %v1436_v30, %v1280_v17 }
 0x742   : > { %v1256_v35 = vadd.f32 0.041655596, %v1255_v29  ;;  %v1263_v3 = vadd.f32 0.008332121, %v1262_v31 }
 0x743   : > { %1594 = vst.msk [vmem:[%s2565_s15] sm:$0xff] %vm351_vm0, %v1592_v50 }
 0x744   : > { %v1257_v36 = vmul.f32 %v1256_v35, %v1254_v6  ;;  %v1264_v38 = vmul.f32 %v1263_v3, %v1254_v6 }
 0x746   : > { %v1258_v39 = vadd.f32 -0.4999988, %v1257_v36  ;;  %v1265_v41 = vadd.f32 -0.16666654, %v1264_v38 }
 0x748   : > { %v1259_v42 = vmul.f32 %v1258_v39, %v1254_v6  ;;  %v1266_v45 = vmul.f32 %v1265_v41, %v1254_v6 }
 0x74a   : > { %v1260_v46 = vadd.f32 1.0, %v1259_v42  ;;  %v1267_v2 = vadd.f32 1.0, %v1266_v45 }
 0x74c   : > { %v1268_v52 = vmul.f32 %v1267_v2, %v1252_v26  ;;  %v1276_v53 = vxor.u32 2147483648, %v1260_v46 }
 0x74e   : > { %v1273_v44 = vxor.u32 2147483648, %v1268_v52  ;;  %v1277_v54 = vsel %vm1275_vm2, %v1276_v53, %v1268_v52  ;;  %v1589_v56 = vsel %vm1587_vm5, %v1276_v53, %v1268_v52 }
 0x750   : > { %v1274_v9 = vsel %vm1272_vm1, %v1260_v46, %v1273_v44  ;;  %v1586_v55 = vsel %vm1584_vm4, %v1260_v46, %v1273_v44 }
 0x751   : > { %v1278_v57 = vsel %vm1271_vm15, %v1274_v9, %v1277_v54  ;;  %v1590_v58 = vsel %vm1583_vm3, %v1586_v55, %v1589_v56 }
 0x752   : > { %v1279_v61 = vsel %vm1269_vm6, nan, %v1278_v57  ;;  %v1591_v0 = vsel %vm1269_vm6, nan, %v1590_v58 }
 0x753   : > { %v1281_v34 = vmul.f32 %v1947_v63, %v1279_v61 }
 0x755   : > { %v1593_v1 = vadd.f32 %v1591_v0, %v1281_v34 }
 0x757   : > { %1595 = vst.msk [vmem:[%s2565_s15 + $0x8] sm:$0xff] %vm351_vm0, %v1593_v1 }
 0x758   : > { %2095 = shalt.err (!%p2092_p11)
}
 0x759   : > { %s2168_s19 = smov 128   ;;  %s2169_s15 = smov 8  }
 0x75a   : > { %1798 = dma.vmem_to_hbm [thread:$0]  (%p2298_p3), %s1610_s28, 256, %s1612_s18, %s1597_s11, %s2168_s19, %s2168_s19, %s2169_s15  }
 0x75b PF: > { %s1626_s1 = sand.u32 1, %s2130_s24   ;;  %p2630_p12 = scmp.ge.s32.totalorder %s2142_s27, 2 }
 0x75c   : > { %s1627_s20 = scalar_lea.sflag [#allocation4], %s1626_s1 }
 0x75d   : > { %p1815_p13 = pnand %p2630_p12, %p2245_p6 }
 0x75f   : > { %p1816_p0 = pneg %p1815_p13 }
 0x761   : > { %2125 = dma.done.wait (%p1816_p0), %s1627_s20, 256  }
 0x762   : > { %2127 = vsyncadd (%p1816_p0), %s1627_s20, 4294967040  ;;  %p22_p5 = scmp.ge.s32.totalorder %s2285_s13, 4   ;;  %s2631_s24 = smov %s2134_s25 }
 0x763   : > { %s2632_s25 = smov %s2138_s26  ;;  %s2633_s26 = smov %s2294_s16 }
 0x764   : > { %s2634_s27 = smov %s2285_s13  ;;  %24 = sbr.rel (!%p22_p5) target bundleno = 9 (0x9), region = 105 }
 0x769   :  { %1633 = vsyncpa [#allocation3], 1 }
 0x76a   :  { %1635 = vsyncpa [#allocation3 + $0x1], 1 }
 0x76b   :  { %1636 = vsyncpa [#allocation6], 1 }
 0x76c   :  { %1637 = vsyncpa [#allocation9], 1 }
 0x76d   :  { %1638 = vsyncpa [#allocation4], 1 }
 0x76e   :  { %1640 = vsyncpa [#allocation4 + $0x1], 1 }

</bundles_post_ra>
